<compile_context>
chip_gen: v6e
topology: v6e:2x2x1
jax: 0.10.0
libtpu: 0.0.40
codegen_flags: <defaults>
</compile_context>

<pallas_src>
import math
import numpy as np
import jax
import jax.numpy as jnp
from jax.experimental import pallas as pl
from jax.experimental.pallas import tpu as pltpu

_EPS = 1e-5                     # eps for InstanceNorm2d / BatchNorm2d / BatchNorm1d
ACT_DTYPE = jnp.bfloat16        # inter-layer activation dtype
_K_CAP = 4608                   # single K grid step for every 3x3 conv in this net


def _round_up(x, m):
    return ((x + m - 1) // m) * m


# ========================= tiled fused matmul kernel =========================
def _make_mm_kernel(act, has_alpha, has_res):
    def kernel(*refs):
        a_ref, b_ref, bias_ref = refs[0], refs[1], refs[2]
        idx = 3
        alpha_ref = None
        res_ref = None
        if has_alpha:
            alpha_ref = refs[idx]; idx += 1
        if has_res:
            res_ref = refs[idx]; idx += 1
        o_ref, acc_ref = refs[idx], refs[idx + 1]

        @pl.when(pl.program_id(2) == 0)
        def _init():
            acc_ref[...] = jnp.zeros_like(acc_ref)

        acc_ref[...] += jnp.dot(a_ref[...], b_ref[...],
                                preferred_element_type=jnp.float32)

        @pl.when(pl.program_id(2) == pl.num_programs(2) - 1)
        def _finalize():
            y = acc_ref[...] + bias_ref[...]
            if has_res:
                y = y + res_ref[...].astype(jnp.float32)
            if act == "relu":
                y = jnp.maximum(y, 0.0)
            elif act == "prelu":
                y = jnp.where(y >= 0.0, y, y * alpha_ref[...])
            elif act == "tanh":
                y = jnp.tanh(y)
            o_ref[...] = y.astype(o_ref.dtype)

    return kernel


def _pick_tiles(M, N, K):
    tm = min(256, _round_up(M, 16))
    if tm == 256 and M <= 256:
        tm = 128                         # >=2 parallel i-blocks for v7x's 2 TensorCores
    tn = 256 if N >= 256 else _round_up(N, 128)
    ksteps = (K + _K_CAP - 1) // _K_CAP  # most convs: 1 K step (K = 576..4608)
    tk = _round_up((K + ksteps - 1) // ksteps, 128)
    return tm, tn, tk


def matmul_fused(a, b, bias=None, alpha=None, residual=None, act="none",
                 out_dtype=jnp.float32):
    """(M,K) @ (K,N) + bias [+ residual] -> act -> (M,N) in out_dtype.

    MXU operands are bf16; accumulation and epilogue stay in f32.  Padding is
    applied only when an operand is not already tile-aligned.
    """
    M, K = a.shape
    _, N = b.shape
    tm, tn, tk = _pick_tiles(M, N, K)
    Mp, Np, Kp = _round_up(M, tm), _round_up(N, tn), _round_up(K, tk)

    a_p = a.astype(jnp.bfloat16)
    if (Mp, Kp) != (M, K):
        a_p = jnp.pad(a_p, ((0, Mp - M), (0, Kp - K)))
    b_p = b.astype(jnp.bfloat16)
    if (Kp, Np) != (K, N):
        b_p = jnp.pad(b_p, ((0, Kp - K), (0, Np - N)))
    bias_v = jnp.zeros((N,), jnp.float32) if bias is None else bias.astype(jnp.float32)
    if Np != N:
        bias_v = jnp.pad(bias_v, (0, Np - N))
    bias_p = bias_v.reshape(1, Np)

    inputs = [a_p, b_p, bias_p]
    in_specs = [
        pl.BlockSpec((tm, tk), lambda i, j, k: (i, k)),
        pl.BlockSpec((tk, tn), lambda i, j, k: (k, j)),
        pl.BlockSpec((1, tn), lambda i, j, k: (0, j)),
    ]
    has_alpha = act == "prelu"
    if has_alpha:
        alpha_v = alpha.astype(jnp.float32)
        if Np != N:
            alpha_v = jnp.pad(alpha_v, (0, Np - N))
        inputs.append(alpha_v.reshape(1, Np))
        in_specs.append(pl.BlockSpec((1, tn), lambda i, j, k: (0, j)))
    has_res = residual is not None
    if has_res:
        res_p = residual
        if (Mp, Np) != (M, N):
            res_p = jnp.pad(res_p, ((0, Mp - M), (0, Np - N)))
        inputs.append(res_p)
        in_specs.append(pl.BlockSpec((tm, tn), lambda i, j, k: (i, j)))

    out = pl.pallas_call(
        _make_mm_kernel(act, has_alpha, has_res),
        out_shape=jax.ShapeDtypeStruct((Mp, Np), out_dtype),
        grid=(Mp // tm, Np // tn, Kp // tk),
        in_specs=in_specs,
        out_specs=pl.BlockSpec((tm, tn), lambda i, j, k: (i, j)),
        scratch_shapes=[pltpu.VMEM((tm, tn), jnp.float32)],
        compiler_params=pltpu.CompilerParams(
            dimension_semantics=("parallel", "parallel", "arbitrary")),
    )(*inputs)
    return out[:M, :N]


# ======================== fused instance-norm kernel =========================
def _make_instnorm_kernel(act, has_res):
    def kernel(*refs):
        x_ref, g_ref, b_ref = refs[0], refs[1], refs[2]
        idx = 3
        a_ref = None
        r_ref = None
        if act == "prelu":
            a_ref = refs[idx]; idx += 1
        if has_res:
            r_ref = refs[idx]; idx += 1
        o_ref = refs[idx]
        x = x_ref[...].astype(jnp.float32)                    # (1, HW, C)
        mean = jnp.mean(x, axis=1, keepdims=True)
        var = jnp.mean(x * x, axis=1, keepdims=True) - mean * mean   # one-pass
        y = (x - mean) * jax.lax.rsqrt(var + _EPS) * g_ref[...] + b_ref[...]
        if act == "relu":
            y = jnp.maximum(y, 0.0)
        elif act == "prelu":
            y = jnp.where(y >= 0.0, y, y * a_ref[...])
        if has_res:
            y = y + r_ref[...].astype(jnp.float32)
        o_ref[...] = y.astype(o_ref.dtype)
    return kernel


def instance_norm(x, gamma=None, beta=None, alpha=None, residual=None, act="none",
                  out_dtype=ACT_DTYPE):
    """InstanceNorm2d (+affine +ReLU/PReLU +residual add) on an NHWC tensor."""
    # TODO(synk): tile the HW axis (two-pass stats) for large images; whole-image
    #             blocks only fit VMEM at the small resolutions used here.
    B, H, W, C = x.shape
    HW = H * W
    g = jnp.ones((1, 1, C), jnp.float32) if gamma is None else gamma.reshape(1, 1, C)
    bt = jnp.zeros((1, 1, C), jnp.float32) if beta is None else beta.reshape(1, 1, C)
    inputs = [x.reshape(B, HW, C), g, bt]
    in_specs = [
        pl.BlockSpec((1, HW, C), lambda b: (b, 0, 0)),
        pl.BlockSpec((1, 1, C), lambda b: (0, 0, 0)),
        pl.BlockSpec((1, 1, C), lambda b: (0, 0, 0)),
    ]
    if act == "prelu":
        inputs.append(alpha.reshape(1, 1, C))
        in_specs.append(pl.BlockSpec((1, 1, C), lambda b: (0, 0, 0)))
    has_res = residual is not None
    if has_res:
        inputs.append(residual.reshape(B, HW, C))
        in_specs.append(pl.BlockSpec((1, HW, C), lambda b: (b, 0, 0)))
    out = pl.pallas_call(
        _make_instnorm_kernel(act, has_res),
        out_shape=jax.ShapeDtypeStruct((B, HW, C), out_dtype),
        grid=(B,),
        in_specs=in_specs,
        out_specs=pl.BlockSpec((1, HW, C), lambda b: (b, 0, 0)),
        compiler_params=pltpu.CompilerParams(dimension_semantics=("parallel",)),
    )(*inputs)
    return out.reshape(B, H, W, C)


# ========== fused InstanceNorm + ReLU + 1x1 conv (+bias +residual) ===========
def _make_in1x1_kernel(has_res):
    def kernel(*refs):
        x_ref, w_ref, b_ref = refs[0], refs[1], refs[2]
        idx = 3
        r_ref = None
        if has_res:
            r_ref = refs[idx]; idx += 1
        o_ref = refs[idx]
        x = x_ref[...].astype(jnp.float32)                    # (1, HW, C)
        mean = jnp.mean(x, axis=1, keepdims=True)
        var = jnp.mean(x * x, axis=1, keepdims=True) - mean * mean
        y = jnp.maximum((x - mean) * jax.lax.rsqrt(var + _EPS), 0.0)
        z = jnp.dot(y[0].astype(jnp.bfloat16), w_ref[...],
                    preferred_element_type=jnp.float32)
        z = z + b_ref[...]
        if has_res:
            z = z + r_ref[0].astype(jnp.float32)
        o_ref[...] = z[None].astype(o_ref.dtype)
    return kernel


def in_relu_conv1x1(x, w, b, residual=None, out_dtype=ACT_DTYPE):
    """InstanceNorm(no affine) -> ReLU -> 1x1 conv (+bias) [+residual], fused."""
    B, H, W, C = x.shape
    Cout = w.shape[-1]
    HW = H * W
    wm = w.reshape(C, Cout).astype(jnp.bfloat16)
    inputs = [x.reshape(B, HW, C), wm, b.reshape(1, Cout).astype(jnp.float32)]
    in_specs = [
        pl.BlockSpec((1, HW, C), lambda i: (i, 0, 0)),
        pl.BlockSpec((C, Cout), lambda i: (0, 0)),
        pl.BlockSpec((1, Cout), lambda i: (0, 0)),
    ]
    has_res = residual is not None
    if has_res:
        inputs.append(residual.reshape(B, HW, Cout))
        in_specs.append(pl.BlockSpec((1, HW, Cout), lambda i: (i, 0, 0)))
    out = pl.pallas_call(
        _make_in1x1_kernel(has_res),
        out_shape=jax.ShapeDtypeStruct((B, HW, Cout), out_dtype),
        grid=(B,),
        in_specs=in_specs,
        out_specs=pl.BlockSpec((1, HW, Cout), lambda i: (i, 0, 0)),
        compiler_params=pltpu.CompilerParams(dimension_semantics=("parallel",)),
    )(*inputs)
    return out.reshape(B, H, W, Cout)


# ========================= fused batch-norm kernel ===========================
def _make_colnorm_kernel(act):
    def kernel(*refs):
        x_ref, g_ref, b_ref = refs[0], refs[1], refs[2]
        idx = 3
        a_ref = None
        if act == "prelu":
            a_ref = refs[idx]; idx += 1
        o_ref = refs[idx]
        x = x_ref[...].astype(jnp.float32)                    # (rows, C)
        mean = jnp.mean(x, axis=0, keepdims=True)
        var = jnp.mean(x * x, axis=0, keepdims=True) - mean * mean
        y = (x - mean) * jax.lax.rsqrt(var + _EPS) * g_ref[...] + b_ref[...]
        if act == "relu":
            y = jnp.maximum(y, 0.0)
        elif act == "prelu":
            y = jnp.where(y >= 0.0, y, y * a_ref[...])
        o_ref[...] = y
    return kernel


def batch_norm_cols(x2d, gamma, beta, alpha=None, act="none"):
    """Training-mode BatchNorm over the rows of a (rows, C) matrix."""
    # TODO(synk): tile rows (reduce-then-normalize) for large B*H*W.
    rows, C = x2d.shape
    inputs = [x2d, gamma.reshape(1, C), beta.reshape(1, C)]
    if act == "prelu":
        inputs.append(alpha.reshape(1, C))
    return pl.pallas_call(
        _make_colnorm_kernel(act),
        out_shape=jax.ShapeDtypeStruct((rows, C), jnp.float32),
    )(*inputs)


# ============================ NHWC op wrappers ================================
def reflect_pad(x, p):
    return jnp.pad(x, ((0, 0), (p, p), (p, p), (0, 0)), mode="reflect")


def max_pool2(x):
    B, H, W, C = x.shape
    return x.reshape(B, H // 2, 2, W // 2, 2, C).max(axis=(2, 4))


def upsample2(x):  # F.interpolate(scale_factor=2), default nearest
    return jnp.repeat(jnp.repeat(x, 2, axis=1), 2, axis=2)


def conv2d(x, w, b=None, stride=1, padding=0, alpha=None, residual=None, act="none",
           out_dtype=ACT_DTYPE):
    """NHWC conv.  x:(B,H,W,Cin), w:(kh,kw,Cin,Cout) HWIO.  im2col built directly
    in bf16 + tiled Pallas matmul with fused bias / residual / activation."""
    B, H, W, Cin = x.shape
    kh, kw, _, Cout = w.shape
    x = x.astype(jnp.bfloat16)                    # cast once, before patch stack
    if padding:
        x = jnp.pad(x, ((0, 0), (padding, padding), (padding, padding), (0, 0)))
    Hp, Wp = x.shape[1], x.shape[2]
    Ho = (Hp - kh) // stride + 1
    Wo = (Wp - kw) // stride + 1
    if kh == 1 and kw == 1 and stride == 1:
        patches = x.reshape(B * Ho * Wo, Cin)
    else:
        cols = []
        for i in range(kh):
            for j in range(kw):
                cols.append(x[:, i:i + stride * (Ho - 1) + 1:stride,
                              j:j + stride * (Wo - 1) + 1:stride, :])
        patches = jnp.stack(cols, axis=3).reshape(B * Ho * Wo, kh * kw * Cin)
    wm = w.reshape(kh * kw * Cin, Cout)
    res2 = None if residual is None else residual.reshape(B * Ho * Wo, Cout)
    y = matmul_fused(patches, wm, bias=b, alpha=alpha, residual=res2, act=act,
                     out_dtype=out_dtype)
    return y.reshape(B, Ho, Wo, Cout)


def conv2d_reflect(x, w, stride=1, pad=1, **kw):
    return conv2d(reflect_pad(x, pad), w, stride=stride, padding=0, **kw)


def _subpixel_weight(w):
    """Pack a (3,3,Cin,Cout) transposed-conv (equivalent-conv) weight into the
    (4*Cin, 4*Cout) matrix of the sub-pixel decomposition (taps [00,01,10,11]
    on rows, sub-pixels [ee,eo,oe,oo] on columns)."""
    Cin, Cout = w.shape[2], w.shape[3]
    Z = jnp.zeros((Cin, Cout), w.dtype)
    col_ee = jnp.concatenate([w[1, 1], Z, Z, Z], axis=0)
    col_eo = jnp.concatenate([w[1, 0], w[1, 2], Z, Z], axis=0)
    col_oe = jnp.concatenate([w[0, 1], Z, w[2, 1], Z], axis=0)
    col_oo = jnp.concatenate([w[0, 0], w[0, 2], w[2, 0], w[2, 2]], axis=0)
    return jnp.concatenate([col_ee, col_eo, col_oe, col_oo], axis=1)


def conv_transpose2d(x, w_hwio, out_dtype=ACT_DTYPE):
    """ConvTranspose2d(k=3,s=2,p=1,op=1) via sub-pixel decomposition: one matmul
    on the un-stuffed input (4 taps -> 4 sub-pixel outputs) + pixel shuffle.
    No zero-stuffed rows, ~4x less matmul/im2col work than zero-stuffing."""
    B, H, W, Cin = x.shape
    Cout = w_hwio.shape[3]
    xp = jnp.pad(x.astype(jnp.bfloat16), ((0, 0), (0, 1), (0, 1), (0, 0)))
    taps = [xp[:, :H, :W, :], xp[:, :H, 1:W + 1, :],
            xp[:, 1:H + 1, :W, :], xp[:, 1:H + 1, 1:W + 1, :]]
    patches = jnp.concatenate(taps, axis=-1).reshape(B * H * W, 4 * Cin)
    wb = _subpixel_weight(w_hwio)
    y = matmul_fused(patches, wb, out_dtype=out_dtype)
    y = y.reshape(B, H, W, 2, 2, Cout)
    y = jnp.transpose(y, (0, 1, 3, 2, 4, 5)).reshape(B, 2 * H, 2 * W, Cout)
    return y


# ================================ parameters ==================================
class ParamGen:
    def __init__(self, seed=0):
        self.rng = np.random.default_rng(seed)

    def normal(self, shape, scale):
        return jnp.asarray((self.rng.standard_normal(size=shape) * scale).astype(np.float32))


def _conv_w(pg, cin, cout, k):           # HWIO layout (no per-call weight transpose)
    return pg.normal((k, k, cin, cout), 1.0 / math.sqrt(cin * k * k))


def _ones(n):
    return jnp.ones((n,), jnp.float32)


def _zeros(n):
    return jnp.zeros((n,), jnp.float32)


def _prelu_a(n):
    return jnp.full((n,), 0.25, jnp.float32)


# ============================== _Residual_Block ===============================
def init_res_block(pg, out_c, in_c=64):
    return {
        "conv1_w": _conv_w(pg, in_c, out_c, 3),
        "in1_g": _ones(out_c), "in1_b": _zeros(out_c),
        "prelu": _prelu_a(out_c),
        "conv2_w": _conv_w(pg, out_c, out_c, 3),
        "in2_g": _ones(out_c), "in2_b": _zeros(out_c),
    }


def res_block_impl(p, x):
    out = conv2d(x, p["conv1_w"], padding=1)
    out = instance_norm(out, p["in1_g"], p["in1_b"], alpha=p["prelu"], act="prelu")
    out = conv2d(out, p["conv2_w"], padding=1)
    return instance_norm(out, p["in2_g"], p["in2_b"], residual=x)   # +identity fused


res_block = jax.jit(res_block_impl)


# =========================== Bottleneck / Hourglass ===========================
def init_bottleneck(pg, inplanes, planes):
    return {
        "c1_w": _conv_w(pg, inplanes, planes, 1), "c1_b": _zeros(planes),
        "c2_w": _conv_w(pg, planes, planes, 3), "c2_b": _zeros(planes),
        "c3_w": _conv_w(pg, planes, planes, 1), "c3_b": _zeros(planes),
    }


def bottleneck_impl(p, x):
    # TODO(synk): fuse the whole bottleneck (incl. the 3x3 conv) into one kernel
    #             keeping the per-sample activation resident in VMEM.
    out = in_relu_conv1x1(x, p["c1_w"], p["c1_b"])                  # IN+ReLU+1x1 fused
    out = instance_norm(out, act="relu")
    out = conv2d(out, p["c2_w"], b=p["c2_b"], padding=1)            # 3x3
    out = in_relu_conv1x1(out, p["c3_w"], p["c3_b"], residual=x)    # IN+ReLU+1x1+res fused
    return out


def run_chain_impl(chain, x):
    for p in chain:
        x = bottleneck_impl(p, x)
    return x


run_chain = jax.jit(run_chain_impl)   # cached per spatial size, reused across 4 hourglasses


def init_hourglass(pg, planes, depth=4, num_blocks=3):
    hg = []
    for i in range(depth):
        res = [[init_bottleneck(pg, planes, planes) for _ in range(num_blocks)]
               for _ in range(3)]
        if i == 0:
            res.append([init_bottleneck(pg, planes, planes) for _ in range(num_blocks)])
        hg.append(res)
    return hg


def hourglass_forward(hg, n, x):
    up1 = run_chain(hg[n - 1][0], x)
    low1 = max_pool2(x)
    low1 = run_chain(hg[n - 1][1], low1)
    if n > 1:
        low2 = hourglass_forward(hg, n - 1, low1)
    else:
        low2 = run_chain(hg[n - 1][3], low1)
    low3 = run_chain(hg[n - 1][2], low2)
    up2 = upsample2(low3)
    return up1 + up2


# ========================= Prior_Estimation_Network ==========================
def init_prior(pg, n_hourglass=4, n_blocks=2, ngf=64, parsing_classes=13, num_landmark=68):
    return {
        "stem": {
            "conv0_w": _conv_w(pg, 3, ngf, 7),
            "res": [init_res_block(pg, ngf, ngf) for _ in range(n_blocks)],
        },
        "hgs": [init_hourglass(pg, ngf, 4, 3) for _ in range(n_hourglass)],
        "heads": {
            "fc_w": _conv_w(pg, ngf, parsing_classes, 1), "fc_b": _zeros(parsing_classes),
            "fc_lm_w": _conv_w(pg, ngf, num_landmark, 1),
        },
    }


@jax.jit
def prior_stem(p, x):
    out = conv2d(reflect_pad(x, 3), p["conv0_w"])
    out = instance_norm(out, act="relu")
    for rp in p["res"]:
        out = res_block_impl(rp, out)
    return out


@jax.jit
def prior_heads(p, out):
    # parsing (13ch, bias) and landmark (68ch, no bias) heads fused into one
    # lane-dense 1x1 conv (81 output channels), then split.
    n_parse = p["fc_w"].shape[-1]
    n_lm = p["fc_lm_w"].shape[-1]
    w_cat = jnp.concatenate([p["fc_w"], p["fc_lm_w"]], axis=-1)
    b_cat = jnp.concatenate([p["fc_b"], jnp.zeros((n_lm,), jnp.float32)])
    y = conv2d(out, w_cat, b=b_cat, out_dtype=jnp.float32)
    parsing = y[..., :n_parse]
    landmark = y[..., n_parse:]
    return landmark, parsing


def prior_forward(p, x):
    out = prior_stem(p["stem"], x)
    for hg in p["hgs"]:
        out = hourglass_forward(hg, 4, out)
    landmark, parsing = prior_heads(p["heads"], out)
    return out, landmark, parsing


# =============================== Fine_SR_Encoder ==============================
def init_fine_encoder(pg, ngf=64, n_blocks=6):
    return {
        "head": {
            "c1_w": _conv_w(pg, 3, ngf, 3),
            "c2_w": _conv_w(pg, ngf, ngf * 2, 3),
            "c3_w": _conv_w(pg, ngf * 2, ngf * 2, 3),
            "c4_w": _conv_w(pg, ngf * 2, ngf * 4, 3),
            "c5_w": _conv_w(pg, ngf * 4, ngf * 4, 3),
        },
        "res": [init_res_block(pg, ngf * 4, ngf * 4) for _ in range(n_blocks)],
        "tail": {
            "ct1_w": _conv_w(pg, ngf * 4, ngf * 2, 3),   # ConvTranspose2d stored as HWIO conv weight
            "c6_w": _conv_w(pg, ngf * 2, ngf * 2, 3),
            "ct2_w": _conv_w(pg, ngf * 2, ngf, 3),
            "c7_w": _conv_w(pg, ngf, ngf, 3),
        },
    }


@jax.jit
def enc_head(p, x):
    out = conv2d_reflect(x, p["c1_w"])
    out = conv2d_reflect(out, p["c2_w"], stride=2)
    out = conv2d_reflect(out, p["c3_w"])
    out = instance_norm(out, act="relu")
    out = conv2d_reflect(out, p["c4_w"], stride=2)
    out = conv2d_reflect(out, p["c5_w"])
    return instance_norm(out, act="relu")


@jax.jit
def enc_tail(p, x):
    out = conv_transpose2d(x, p["ct1_w"])
    out = conv2d_reflect(out, p["c6_w"])
    out = instance_norm(out, act="relu")
    out = conv_transpose2d(out, p["ct2_w"])
    out = conv2d_reflect(out, p["c7_w"])
    return instance_norm(out, act="relu")


def fine_encoder_forward(p, x):
    out = enc_head(p["head"], x)
    for rp in p["res"]:
        out = res_block(rp, out)
    return enc_tail(p["tail"], out)


# =============================== Fine_SR_Decoder ==============================
def init_fine_decoder(pg, ngf=128, n_blocks=6):
    return {
        "head": {
            "d1_w": _conv_w(pg, ngf, ngf * 2, 3),
            "d2_w": _conv_w(pg, ngf * 2, ngf * 2, 3),
            "d3_w": _conv_w(pg, ngf * 2, ngf * 4, 3),
            "d4_w": _conv_w(pg, ngf * 4, ngf * 4, 3),
        },
        "res": [init_res_block(pg, ngf * 4, ngf * 4) for _ in range(n_blocks)],
        "tail": {
            "ct1_w": _conv_w(pg, ngf * 4, ngf * 2, 3),
            "d5_w": _conv_w(pg, ngf * 2, ngf * 2, 3),
            "ct2_w": _conv_w(pg, ngf * 2, ngf, 3),
            "d6_w": _conv_w(pg, ngf, ngf, 3),
            "dout_w": _conv_w(pg, ngf, 3, 3),
        },
    }


@jax.jit
def dec_head(p, x):
    out = conv2d_reflect(x, p["d1_w"], stride=2)
    out = conv2d_reflect(out, p["d2_w"])
    out = instance_norm(out, act="relu")
    out = conv2d_reflect(out, p["d3_w"], stride=2)
    out = conv2d_reflect(out, p["d4_w"])
    return instance_norm(out, act="relu")


@jax.jit
def dec_tail(p, x):
    out = conv_transpose2d(x, p["ct1_w"])
    out = conv2d_reflect(out, p["d5_w"])
    out = instance_norm(out, act="relu")
    out = conv_transpose2d(out, p["ct2_w"])
    out = conv2d_reflect(out, p["d6_w"])
    out = instance_norm(out, act="relu")
    return conv2d_reflect(out, p["dout_w"], act="tanh", out_dtype=jnp.float32)


def fine_decoder_forward(p, x):
    out = dec_head(p["head"], x)
    for rp in p["res"]:
        out = res_block(rp, out)
    return dec_tail(p["tail"], out)


# ================================ Discriminator ===============================
def init_discriminator(pg, in_channels, spatial):
    # TODO(synk): reference declares conv_input with in_channels=192 but the concat
    #             actually fed to it is 64+64=128 channels; sized to the real data flow.
    # TODO(synk): reference fc hard-codes nn.Linear(64*56*56, 512); scaled to the actual
    #             feature-map size; fc weight stored (in, out) to avoid a runtime transpose.
    # NOTE: reference builds `self.residual` but never uses it in forward -> omitted.
    fan_in = 64 * spatial * spatial
    return {
        "conv_in_w": _conv_w(pg, in_channels, 64, 3), "conv_in_b": _zeros(64),
        "prelu": _prelu_a(64),
        "bn_mid_g": _ones(64), "bn_mid_b": _zeros(64),
        "fc_w": pg.normal((fan_in, 512), 1.0 / math.sqrt(fan_in)),
        "fc_b": _zeros(512),
        "bn_end_g": _ones(512), "bn_end_b": _zeros(512),
    }


@jax.jit
def discriminator_forward(p, x):
    out = conv2d(x, p["conv_in_w"], b=p["conv_in_b"], padding=1, out_dtype=jnp.float32)
    B, H, W, C = out.shape
    flat = out.reshape(B * H * W, C)
    flat = batch_norm_cols(flat, p["bn_mid_g"], p["bn_mid_b"],
                           alpha=p["prelu"], act="prelu")
    flat = batch_norm_cols(flat, p["bn_mid_g"], p["bn_mid_b"])  # bn_mid applied twice, as in reference
    out = flat.reshape(B, H, W, C)
    # flatten in PyTorch (C,H,W) order before the fc
    flat_fc = jnp.transpose(out, (0, 3, 1, 2)).reshape(B, C * H * W)
    emb = matmul_fused(flat_fc, p["fc_w"], bias=p["fc_b"])
    return batch_norm_cols(emb, p["bn_end_g"], p["bn_end_b"])


# ============================ Coarse SR (stand-in) ============================
def init_coarse(pg):
    # TODO(synk): Course_SR_Network is not defined in the reference source; a minimal
    #             deterministic stand-in (conv -> PReLU -> conv + residual) returning
    #             (features, coarse_image) is used instead.
    return {
        "c1_w": _conv_w(pg, 3, 64, 3), "c1_b": _zeros(64),
        "prelu": _prelu_a(64),
        "c2_w": _conv_w(pg, 64, 3, 3), "c2_b": _zeros(3),
    }


@jax.jit
def coarse_forward(p, lr):
    feat = conv2d(lr, p["c1_w"], b=p["c1_b"], padding=1,
                  alpha=p["prelu"], act="prelu")
    coarse = conv2d(feat, p["c2_w"], b=p["c2_b"], padding=1, residual=lr,
                    out_dtype=jnp.float32)
    return feat, coarse


# ============================= OverallNetwork_GAN =============================
def init_overall(pg, spatial):
    return {
        "coarse": init_coarse(pg),
        "prior": init_prior(pg),
        "enc": init_fine_encoder(pg),
        "dec": init_fine_decoder(pg),
        "disc": init_discriminator(pg, in_channels=128, spatial=spatial),
    }


def overall_forward(params, lr_nchw, hr_nchw):
    to_nhwc = lambda t: jnp.transpose(t, (0, 2, 3, 1))
    to_nchw = lambda t: jnp.transpose(t, (0, 3, 1, 2))
    lr = to_nhwc(lr_nchw)
    hr = to_nhwc(hr_nchw)
    B = lr.shape[0]

    _, coarse = coarse_forward(params["coarse"], lr)

    # The encoder / prior path is purely per-sample (convs + instance norms), so the
    # two forward_once passes (coarse and hr) are batched together for 2x matmul M.
    x_both = jnp.concatenate([coarse, hr], axis=0)
    out_sr = fine_encoder_forward(params["enc"], x_both)
    out_pe, landmark, parsing = prior_forward(params["prior"], x_both)
    out_both = jnp.concatenate([out_pe, out_sr], axis=-1)       # channel concat (NHWC)

    out1, out2 = out_both[:B], out_both[B:]
    # TODO(synk): batching the two discriminator passes would merge training-mode
    #             BatchNorm statistics -> kept per-pass to match the reference.
    embedding1 = discriminator_forward(params["disc"], out1)
    embedding2 = discriminator_forward(params["disc"], out2)

    sr = fine_decoder_forward(params["dec"], out1)

    return (to_nchw(sr), to_nchw(coarse), to_nchw(landmark[:B]),
            to_nchw(parsing[:B]), embedding1, embedding2)


# ===================================== main ===================================
if __name__ == "__main__":
    B, H, W = 2, 16, 16  # spatial must be divisible by 16 (hourglass depth 4)
    key = jax.random.PRNGKey(0)
    k_lr, k_hr = jax.random.split(key)
    lr = jax.random.normal(k_lr, (B, 3, H, W), dtype=jnp.float32)
    hr = jax.random.normal(k_hr, (B, 3, H, W), dtype=jnp.float32)

    params = init_overall(ParamGen(seed=0), spatial=H)

    outs = overall_forward(params, lr, hr)
    jax.block_until_ready(outs)
    print("KERNEL_OK")
</pallas_src>

<mosaic_0001>
module attributes {stable_mosaic.version = 11 : i64} {
  func.func @kernel(%arg0: i32, %arg1: i32, %arg2: i32, %arg3: memref<256x128xbf16, #tpu.memory_space<vmem>>, %arg4: memref<128x128xbf16, #tpu.memory_space<vmem>>, %arg5: memref<1x128xf32, #tpu.memory_space<vmem>>, %arg6: memref<1x128xf32, #tpu.memory_space<vmem>>, %arg7: memref<256x128xbf16, #tpu.memory_space<vmem>>, %arg8: memref<256x128xf32, #tpu.memory_space<vmem>>) attributes {dimension_semantics = [#tpu.dimension_semantics<parallel>, #tpu.dimension_semantics<parallel>, #tpu.dimension_semantics<arbitrary>], iteration_bounds = array<i64: 2, 1, 1>, scalar_prefetch = 0 : i64, scratch_operands = 1 : i64, tpu.core_type = #tpu.core_type<tc>, window_params = [{transform_indices = @transform_0, window_bounds = array<i64: 256, 128>}, {transform_indices = @transform_1, window_bounds = array<i64: 128, 128>}, {transform_indices = @transform_2, window_bounds = array<i64: 1, 128>}, {transform_indices = @transform_3, window_bounds = array<i64: 1, 128>}, {transform_indices = @transform_4, window_bounds = array<i64: 256, 128>}]} {
    %c0_i32 = arith.constant 0 : i32
    %0 = arith.cmpi eq, %arg2, %c0_i32 : i32
    %1 = arith.extui %0 : i1 to i32
    %c0_i32_0 = arith.constant 0 : i32
    %2 = arith.cmpi ne, %1, %c0_i32_0 : i32
    scf.if %2 {
      %cst_10 = arith.constant 0.000000e+00 : f32
      %12 = vector.broadcast %cst_10 : f32 to vector<256x128xf32>
      %c0_11 = arith.constant 0 : index
      %c0_12 = arith.constant 0 : index
      %13 = vector.load %arg8[%c0_11, %c0_12] : memref<256x128xf32, #tpu.memory_space<vmem>>, vector<256x128xf32>
      tpu.vector_store %arg8[%c0_11, %c0_12], %12 {strides = array<i32>} : memref<256x128xf32, #tpu.memory_space<vmem>>, vector<256x128xf32>,
    } else {
    }
    %c0 = arith.constant 0 : index
    %c0_1 = arith.constant 0 : index
    %3 = vector.load %arg8[%c0, %c0_1] : memref<256x128xf32, #tpu.memory_space<vmem>>, vector<256x128xf32>
    %c0_2 = arith.constant 0 : index
    %c0_3 = arith.constant 0 : index
    %4 = vector.load %arg3[%c0_2, %c0_3] : memref<256x128xbf16, #tpu.memory_space<vmem>>, vector<256x128xbf16>
    %c0_4 = arith.constant 0 : index
    %c0_5 = arith.constant 0 : index
    %5 = vector.load %arg4[%c0_4, %c0_5] : memref<128x128xbf16, #tpu.memory_space<vmem>>, vector<128x128xbf16>
    %cst = arith.constant dense<0.000000e+00> : vector<256x128xf32>
    %6 = tpu.matmul %4, %5, %cst {dimension_numbers = #tpu.dot_dimension_numbers<[1], [0], [0], [1], [0, 0, 1, 1], [], []>} : vector<256x128xbf16>, vector<128x128xbf16>, vector<256x128xf32> -> vector<256x128xf32>
    %7 = arith.addf %3, %6 : vector<256x128xf32>
    %c0_6 = arith.constant 0 : index
    %c0_7 = arith.constant 0 : index
    %8 = vector.load %arg8[%c0_6, %c0_7] : memref<256x128xf32, #tpu.memory_space<vmem>>, vector<256x128xf32>
    tpu.vector_store %arg8[%c0_6, %c0_7], %7 {strides = array<i32>} : memref<256x128xf32, #tpu.memory_space<vmem>>, vector<256x128xf32>,
    %c0_i32_8 = arith.constant 0 : i32
    %9 = arith.cmpi eq, %arg2, %c0_i32_8 : i32
    %10 = arith.extui %9 : i1 to i32
    %c0_i32_9 = arith.constant 0 : i32
    %11 = arith.cmpi ne, %10, %c0_i32_9 : i32
    scf.if %11 {
      %c0_10 = arith.constant 0 : index
      %c0_11 = arith.constant 0 : index
      %12 = vector.load %arg8[%c0_10, %c0_11] : memref<256x128xf32, #tpu.memory_space<vmem>>, vector<256x128xf32>
      %c0_12 = arith.constant 0 : index
      %c0_13 = arith.constant 0 : index
      %13 = vector.load %arg5[%c0_12, %c0_13] : memref<1x128xf32, #tpu.memory_space<vmem>>, vector<1x128xf32>
      %14 = vector.broadcast %13 : vector<1x128xf32> to vector<256x128xf32>
      %15 = arith.addf %12, %14 : vector<256x128xf32>
      %cst_14 = arith.constant 0.000000e+00 : f32
      %16 = vector.broadcast %cst_14 : f32 to vector<256x128xf32>
      %17 = arith.cmpf oge, %15, %16 : vector<256x128xf32>
      %c0_15 = arith.constant 0 : index
      %c0_16 = arith.constant 0 : index
      %18 = vector.load %arg6[%c0_15, %c0_16] : memref<1x128xf32, #tpu.memory_space<vmem>>, vector<1x128xf32>
      %19 = vector.broadcast %18 : vector<1x128xf32> to vector<256x128xf32>
      %20 = arith.mulf %15, %19 : vector<256x128xf32>
      %21 = arith.select %17, %15, %20 : vector<256x128xi1>, vector<256x128xf32>
      %22 = arith.truncf %21 : vector<256x128xf32> to vector<256x128xbf16>
      %c0_17 = arith.constant 0 : index
      %c0_18 = arith.constant 0 : index
      %23 = vector.load %arg7[%c0_17, %c0_18] : memref<256x128xbf16, #tpu.memory_space<vmem>>, vector<256x128xbf16>
      tpu.vector_store %arg7[%c0_17, %c0_18], %22 {strides = array<i32>} : memref<256x128xbf16, #tpu.memory_space<vmem>>, vector<256x128xbf16>,
    } else {
    }
    return
  }
  func.func @transform_0(%arg0: i32, %arg1: i32, %arg2: i32) -> (i32, i32) {
    %c0_i32 = arith.constant 0 : i32
    return %arg0, %arg2 : i32, i32
  }
  func.func @transform_1(%arg0: i32, %arg1: i32, %arg2: i32) -> (i32, i32) {
    %c0_i32 = arith.constant 0 : i32
    return %arg2, %arg1 : i32, i32
  }
  func.func @transform_2(%arg0: i32, %arg1: i32, %arg2: i32) -> (i32, i32) {
    %c0_i32 = arith.constant 0 : i32
    %c0_i32_0 = arith.constant 0 : i32
    return %c0_i32, %arg1 : i32, i32
  }
  func.func @transform_3(%arg0: i32, %arg1: i32, %arg2: i32) -> (i32, i32) {
    %c0_i32 = arith.constant 0 : i32
    %c0_i32_0 = arith.constant 0 : i32
    return %c0_i32, %arg1 : i32, i32
  }
  func.func @transform_4(%arg0: i32, %arg1: i32, %arg2: i32) -> (i32, i32) {
    %c0_i32 = arith.constant 0 : i32
    return %arg0, %arg1 : i32, i32
  }
}

module attributes {stable_mosaic.version = 11 : i64} {
  func.func @kernel(%arg0: i32, %arg1: i32, %arg2: i32, %arg3: memref<256x640xbf16, #tpu.memory_space<vmem>>, %arg4: memref<640x128xbf16, #tpu.memory_space<vmem>>, %arg5: memref<1x128xf32, #tpu.memory_space<vmem>>, %arg6: memref<256x128xf32, #tpu.memory_space<vmem>>, %arg7: memref<256x128xf32, #tpu.memory_space<vmem>>, %arg8: memref<256x128xf32, #tpu.memory_space<vmem>>) attributes {dimension_semantics = [#tpu.dimension_semantics<parallel>, #tpu.dimension_semantics<parallel>, #tpu.dimension_semantics<arbitrary>], iteration_bounds = array<i64: 2, 1, 1>, scalar_prefetch = 0 : i64, scratch_operands = 1 : i64, tpu.core_type = #tpu.core_type<tc>, window_params = [{transform_indices = @transform_0, window_bounds = array<i64: 256, 640>}, {transform_indices = @transform_1, window_bounds = array<i64: 640, 128>}, {transform_indices = @transform_2, window_bounds = array<i64: 1, 128>}, {transform_indices = @transform_3, window_bounds = array<i64: 256, 128>}, {transform_indices = @transform_4, window_bounds = array<i64: 256, 128>}]} {
    %c0_i32 = arith.constant 0 : i32
    %0 = arith.cmpi eq, %arg2, %c0_i32 : i32
    %1 = arith.extui %0 : i1 to i32
    %c0_i32_0 = arith.constant 0 : i32
    %2 = arith.cmpi ne, %1, %c0_i32_0 : i32
    scf.if %2 {
      %cst_10 = arith.constant 0.000000e+00 : f32
      %12 = vector.broadcast %cst_10 : f32 to vector<256x128xf32>
      %c0_11 = arith.constant 0 : index
      %c0_12 = arith.constant 0 : index
      %13 = vector.load %arg8[%c0_11, %c0_12] : memref<256x128xf32, #tpu.memory_space<vmem>>, vector<256x128xf32>
      tpu.vector_store %arg8[%c0_11, %c0_12], %12 {strides = array<i32>} : memref<256x128xf32, #tpu.memory_space<vmem>>, vector<256x128xf32>,
    } else {
    }
    %c0 = arith.constant 0 : index
    %c0_1 = arith.constant 0 : index
    %3 = vector.load %arg8[%c0, %c0_1] : memref<256x128xf32, #tpu.memory_space<vmem>>, vector<256x128xf32>
    %c0_2 = arith.constant 0 : index
    %c0_3 = arith.constant 0 : index
    %4 = vector.load %arg3[%c0_2, %c0_3] : memref<256x640xbf16, #tpu.memory_space<vmem>>, vector<256x640xbf16>
    %c0_4 = arith.constant 0 : index
    %c0_5 = arith.constant 0 : index
    %5 = vector.load %arg4[%c0_4, %c0_5] : memref<640x128xbf16, #tpu.memory_space<vmem>>, vector<640x128xbf16>
    %cst = arith.constant dense<0.000000e+00> : vector<256x128xf32>
    %6 = tpu.matmul %4, %5, %cst {dimension_numbers = #tpu.dot_dimension_numbers<[1], [0], [0], [1], [0, 0, 1, 1], [], []>} : vector<256x640xbf16>, vector<640x128xbf16>, vector<256x128xf32> -> vector<256x128xf32>
    %7 = arith.addf %3, %6 : vector<256x128xf32>
    %c0_6 = arith.constant 0 : index
    %c0_7 = arith.constant 0 : index
    %8 = vector.load %arg8[%c0_6, %c0_7] : memref<256x128xf32, #tpu.memory_space<vmem>>, vector<256x128xf32>
    tpu.vector_store %arg8[%c0_6, %c0_7], %7 {strides = array<i32>} : memref<256x128xf32, #tpu.memory_space<vmem>>, vector<256x128xf32>,
    %c0_i32_8 = arith.constant 0 : i32
    %9 = arith.cmpi eq, %arg2, %c0_i32_8 : i32
    %10 = arith.extui %9 : i1 to i32
    %c0_i32_9 = arith.constant 0 : i32
    %11 = arith.cmpi ne, %10, %c0_i32_9 : i32
    scf.if %11 {
      %c0_10 = arith.constant 0 : index
      %c0_11 = arith.constant 0 : index
      %12 = vector.load %arg8[%c0_10, %c0_11] : memref<256x128xf32, #tpu.memory_space<vmem>>, vector<256x128xf32>
      %c0_12 = arith.constant 0 : index
      %c0_13 = arith.constant 0 : index
      %13 = vector.load %arg5[%c0_12, %c0_13] : memref<1x128xf32, #tpu.memory_space<vmem>>, vector<1x128xf32>
      %14 = vector.broadcast %13 : vector<1x128xf32> to vector<256x128xf32>
      %15 = arith.addf %12, %14 : vector<256x128xf32>
      %c0_14 = arith.constant 0 : index
      %c0_15 = arith.constant 0 : index
      %16 = vector.load %arg6[%c0_14, %c0_15] : memref<256x128xf32, #tpu.memory_space<vmem>>, vector<256x128xf32>
      %17 = arith.addf %15, %16 : vector<256x128xf32>
      %c0_16 = arith.constant 0 : index
      %c0_17 = arith.constant 0 : index
      %18 = vector.load %arg7[%c0_16, %c0_17] : memref<256x128xf32, #tpu.memory_space<vmem>>, vector<256x128xf32>
      tpu.vector_store %arg7[%c0_16, %c0_17], %17 {strides = array<i32>} : memref<256x128xf32, #tpu.memory_space<vmem>>, vector<256x128xf32>,
    } else {
    }
    return
  }
  func.func @transform_0(%arg0: i32, %arg1: i32, %arg2: i32) -> (i32, i32) {
    %c0_i32 = arith.constant 0 : i32
    return %arg0, %arg2 : i32, i32
  }
  func.func @transform_1(%arg0: i32, %arg1: i32, %arg2: i32) -> (i32, i32) {
    %c0_i32 = arith.constant 0 : i32
    return %arg2, %arg1 : i32, i32
  }
  func.func @transform_2(%arg0: i32, %arg1: i32, %arg2: i32) -> (i32, i32) {
    %c0_i32 = arith.constant 0 : i32
    %c0_i32_0 = arith.constant 0 : i32
    return %c0_i32, %arg1 : i32, i32
  }
  func.func @transform_3(%arg0: i32, %arg1: i32, %arg2: i32) -> (i32, i32) {
    %c0_i32 = arith.constant 0 : i32
    return %arg0, %arg1 : i32, i32
  }
  func.func @transform_4(%arg0: i32, %arg1: i32, %arg2: i32) -> (i32, i32) {
    %c0_i32 = arith.constant 0 : i32
    return %arg0, %arg1 : i32, i32
  }
}

</mosaic_0001>

<bundles_post_ra>
// kernel: coarse_forward.2
= control target key start
LH: loop header
LB: loop body
LE: loop exit
PB: predicated region body
PF: predicated region fallthrough
CT: control target
= control target key end

     0   :  { %s1630_s15 = smov 0   ;;  %s1632_s16 = smov 0   ;;  %s1808_s0 = inlined_call_operand.vmem [shape: bf16[512,128], index: 0, kind: input, shape index: {}]   ;;  %s1809_s1 = inlined_call_operand.vmem [shape: bf16[128,128], index: 1, kind: input, shape index: {}]   ;;  %s1810_s2 = inlined_call_operand.vmem [shape: f32[1,128], index: 2, kind: input, shape index: {}]   ;;  %s1811_s3 = inlined_call_operand.vmem [shape: f32[1,128], index: 3, kind: input, shape index: {}]   ;;  %s1812_s4 = inlined_call_operand.vmem [shape: bf16[512,128], index: 4, kind: output, shape index: {}]  }
   0x1   :  { %s1634_s17 = smov 0  }
   0x2 LB: > { %s33_s18 = sadd.s32 1, %s1599_s16  ;;  %p1253_p0 = scmp.ge.s32.totalorder %s1603_s17, 1  ;;  %s1603_s17 = sphi %s1634_s17, %s14_s17   ;;  %s1599_s16 = sphi %s1632_s16, %s1814_s16   ;;  %s1595_s15 = sphi %s1630_s15, %s1813_s15  }
   0x3   : > { %p35_p1 = scmp.ge.s32.totalorder %s33_s18, 2  ;;  %p221_p2 = scmp.lt.s32.totalorder %s1603_s17, 3 }
   0x5   : > { %s1816_s18 = smov (%p35_p1, %s33_s18), 0  ;;  %p222_p3 = pnand %p1253_p0, %p221_p2 }
   0x6   : > { %s1254_s21 = sshll.u32 (!%p222_p3), %s1595_s15, 5 }
   0x7   : > { %225 = sbr.rel (%p222_p3) target bundleno = 280 (0x118), region = 36  ;;  %p268_p4 = scmp.lt.s32.totalorder (!%p222_p3), %s1254_s21, 63 }
   0xc   : > { %v1557_v0 = vld [vmem:[%s1809_s1 + $0x38] sm:$0xff]   ;;  %v1558_v1 = vld [vmem:[%s1809_s1 + $0x30] sm:$0xff]   ;;  %s1818_s21 = smov (!%p268_p4, %s1254_s21), 63  ;;  %v1559_v2 = vld [vmem:[%s1809_s1 + $0x28] sm:$0xff]  }
   0xd   : > { %1469 = vmatprep.subr.bf16.mxu0 %v1557_v0  ;;  %1517 = vmatprep.subr.bf16.mxu1 %v1557_v0  ;;  %s1255_s26 = sshll.u32 %s1818_s21, 2  ;;  %v1560_v3 = vld [vmem:[%s1809_s1 + $0x20] sm:$0xff]   ;;  %v1561_v6 = vld [vmem:[%s1809_s1 + $0x18] sm:$0xff]   ;;  %v1562_v7 = vld [vmem:[%s1809_s1 + $0x10] sm:$0xff]  }
   0xe   : > { %1470 = vmatpush3.bf16.msra.mxu0 %v1557_v0  ;;  %1525 = vmatpush3.bf16.msra.mxu1 %v1557_v0  ;;  %s1665_s29 = scalar_lea.vmem %s1808_s0, %s1255_s26  ;;  %v1563_v8 = vld [vmem:[%s1809_s1 + $0x8] sm:$0xff]   ;;  %v1564_v9 = vld [vmem:[%s1809_s1] sm:$0xff]   ;;  %s1727_s24 = scalar_lea.vmem %s1812_s4, %s1255_s26 }
   0xf   : > { %1471 = vmatprep.subr.bf16.mxu0 %v1558_v1  ;;  %1518 = vmatprep.subr.bf16.mxu1 %v1558_v1  ;;  %v1565_v4 = vld [vmem:[%s1665_s29] sm:$0xff]   ;;  %v1567_v10 = vld [vmem:[%s1665_s29 + $0x8] sm:$0xff]   ;;  %v1569_v12 = vld [vmem:[%s1665_s29 + $0x10] sm:$0xff]  }
  0x10   : > { %v1566_v5 = vld [vmem:[%s1665_s29 + $0x40] sm:$0xff]   ;;  %1485 = vmatprep.mubr.bf16.mxu0 %v1565_v4  ;;  %v1568_v11 = vld [vmem:[%s1665_s29 + $0x48] sm:$0xff]   ;;  %v1570_v13 = vld [vmem:[%s1665_s29 + $0x50] sm:$0xff]  }
  0x11   : > { %1501 = vmatprep.mubr.bf16.mxu1 %v1566_v5  ;;  %v1571_v14 = vld [vmem:[%s1665_s29 + $0x18] sm:$0xff]   ;;  %v1573_v16 = vld [vmem:[%s1665_s29 + $0x20] sm:$0xff]   ;;  %v1575_v18 = vld [vmem:[%s1665_s29 + $0x28] sm:$0xff]  }
  0x12   : > { %1472 = vmatpush3.bf16.msra.mxu0 %v1558_v1  ;;  %1526 = vmatpush3.bf16.msra.mxu1 %v1558_v1  ;;  %v1572_v15 = vld [vmem:[%s1665_s29 + $0x58] sm:$0xff]   ;;  %v1574_v17 = vld [vmem:[%s1665_s29 + $0x60] sm:$0xff]   ;;  %v1576_v19 = vld [vmem:[%s1665_s29 + $0x68] sm:$0xff]  }
  0x13   : > { %1473 = vmatprep.subr.bf16.mxu0 %v1559_v2  ;;  %1519 = vmatprep.subr.bf16.mxu1 %v1559_v2  ;;  %v1577_v20 = vld [vmem:[%s1665_s29 + $0x30] sm:$0xff]   ;;  %v1579_v22 = vld [vmem:[%s1665_s29 + $0x38] sm:$0xff]   ;;  %v1701_v24 = vld [vmem:[%s1810_s2] ss:$0 sm:$0xff] }
  0x14   : > { %v1578_v21 = vld [vmem:[%s1665_s29 + $0x70] sm:$0xff]   ;;  %v1580_v23 = vld [vmem:[%s1665_s29 + $0x78] sm:$0xff]   ;;  %v1706_v26 = vld [vmem:[%s1811_s3] ss:$0 sm:$0xff] }
  0x16   : > { %1474 = vmatpush3.bf16.msra.mxu0 %v1559_v2  ;;  %1527 = vmatpush3.bf16.msra.mxu1 %v1559_v2 }
  0x17   : > { %1475 = vmatprep.subr.bf16.mxu0 %v1560_v3  ;;  %1520 = vmatprep.subr.bf16.mxu1 %v1560_v3 }
  0x1a   : > { %1476 = vmatpush3.bf16.msra.mxu0 %v1560_v3  ;;  %1528 = vmatpush3.bf16.msra.mxu1 %v1560_v3 }
  0x1b   : > { %1477 = vmatprep.subr.bf16.mxu0 %v1561_v6  ;;  %1521 = vmatprep.subr.bf16.mxu1 %v1561_v6 }
  0x1e   : > { %1478 = vmatpush3.bf16.msra.mxu0 %v1561_v6  ;;  %1529 = vmatpush3.bf16.msra.mxu1 %v1561_v6 }
  0x1f   : > { %1479 = vmatprep.subr.bf16.mxu0 %v1562_v7  ;;  %1522 = vmatprep.subr.bf16.mxu1 %v1562_v7 }
  0x22   : > { %1480 = vmatpush3.bf16.msra.mxu0 %v1562_v7  ;;  %1530 = vmatpush3.bf16.msra.mxu1 %v1562_v7 }
  0x23   : > { %1481 = vmatprep.subr.bf16.mxu0 %v1563_v8  ;;  %1523 = vmatprep.subr.bf16.mxu1 %v1563_v8 }
  0x26   : > { %1482 = vmatpush3.bf16.msra.mxu0 %v1563_v8  ;;  %1531 = vmatpush3.bf16.msra.mxu1 %v1563_v8 }
  0x27   : > { %1483 = vmatprep.subr.bf16.mxu0 %v1564_v9  ;;  %1524 = vmatprep.subr.bf16.mxu1 %v1564_v9 }
  0x2a   : > { %1484 = vmatpush3.bf16.msra.mxu0 %v1564_v9  ;;  %1532 = vmatpush3.bf16.msra.mxu1 %v1564_v9 }
  0x2d   : > { %1486 = vmatmul.mubr.bf16.vlgmr.msra.gmra.mxu0 %v1567_v10  ;;  %1502 = vmatmul.mubr.bf16.vlgmr.msra.gmra.mxu1 %v1568_v11 }
  0x2e   : > { %1489 = vmatprep.mubr.bf16.mxu0 %v1569_v12  ;;  %1505 = vmatprep.mubr.bf16.mxu1 %v1570_v13 }
  0x35   : > { %1490 = vmatmul.mubr.bf16.gmra.mxu0 %v1571_v14  ;;  %1506 = vmatmul.mubr.bf16.gmra.mxu1 %v1572_v15 }
  0x36   : > { %1493 = vmatprep.mubr.bf16.mxu0 %v1573_v16  ;;  %1509 = vmatprep.mubr.bf16.mxu1 %v1574_v17 }
  0x3d   : > { %1494 = vmatmul.mubr.bf16.gmra.mxu0 %v1575_v18  ;;  %1510 = vmatmul.mubr.bf16.gmra.mxu1 %v1576_v19 }
  0x3e   : > { %1497 = vmatprep.mubr.bf16.mxu0 %v1577_v20  ;;  %1513 = vmatprep.mubr.bf16.mxu1 %v1578_v21 }
  0x45   : > { %1498 = vmatmul.mubr.bf16.gmra.mxu0 %v1579_v22  ;;  %1514 = vmatmul.mubr.bf16.gmra.mxu1 %v1580_v23 }
  0xed   : > { %v1487_v25 = vpop.f32.mrf.mxu0  ;;  %v1503_v27 = vpop.f32.mrf.mxu1 }
  0xee   : > { %v830_v28 = vadd.f32 %v1487_v25, %v1701_v24  ;;  %v846_v29 = vadd.f32 %v1503_v27, %v1701_v24 }
  0xef   : > { %v595_v30 = vpop.f32.mrf.mxu0  ;;  %v659_v31 = vpop.f32.mrf.mxu1 }
  0xf0   : > { %vm862_vm0 = vcmp.ge.f32.partialorder %v830_v28, 0.0  ;;  %v901_v32 = vmul.f32 %v1706_v26, %v830_v28  ;;  %vm878_vm1 = vcmp.ge.f32.partialorder %v846_v29, 0.0  ;;  %v917_v33 = vmul.f32 %v1706_v26, %v846_v29 }
  0xf1   : > { %v828_v34 = vadd.f32 %v1701_v24, %v595_v30  ;;  %v844_v35 = vadd.f32 %v1701_v24, %v659_v31  ;;  %v1488_v36 = vpop.f32.mrf.mxu0  ;;  %v1504_v37 = vpop.f32.mrf.mxu1 }
  0xf2   : > { %v933_v38 = vsel %vm862_vm0, %v830_v28, %v901_v32  ;;  %v831_v39 = vadd.f32 %v1488_v36, %v1701_v24  ;;  %v847_v40 = vadd.f32 %v1504_v37, %v1701_v24  ;;  %v949_v41 = vsel %vm878_vm1, %v846_v29, %v917_v33 }
  0xf3   : > { %vm860_vm2 = vcmp.ge.f32.partialorder %v828_v34, 0.0  ;;  %v899_v42 = vmul.f32 %v1706_v26, %v828_v34  ;;  %vm876_vm3 = vcmp.ge.f32.partialorder %v844_v35, 0.0  ;;  %v598_v43 = vpop.f32.mrf.mxu0  ;;  %v662_v44 = vpop.f32.mrf.mxu1  ;;  %v915_v48 = vmul.f32 %v1706_v26, %v844_v35 }
  0xf4   : > { %vm863_vm4 = vcmp.ge.f32.partialorder %v831_v39, 0.0  ;;  %v902_v45 = vmul.f32 %v1706_v26, %v831_v39  ;;  %vm879_vm5 = vcmp.ge.f32.partialorder %v847_v40, 0.0  ;;  %v918_v46 = vmul.f32 %v1706_v26, %v847_v40 }
  0xf5   : > { %v931_v47 = vsel %vm860_vm2, %v828_v34, %v899_v42  ;;  %v829_v49 = vadd.f32 %v1701_v24, %v598_v43  ;;  %v845_v50 = vadd.f32 %v1701_v24, %v662_v44  ;;  %v1491_v51 = vpop.f32.mrf.mxu0  ;;  %v1507_v52 = vpop.f32.mrf.mxu1  ;;  %v947_v0 = vsel %vm876_vm3, %v844_v35, %v915_v48 }
  0xf6   : > { %v934_v53 = vsel %vm863_vm4, %v831_v39, %v902_v45  ;;  %v950_v54 = vsel %vm879_vm5, %v847_v40, %v918_v46  ;;  %v834_v55 = vadd.f32 %v1491_v51, %v1701_v24  ;;  %v850_v56 = vadd.f32 %v1507_v52, %v1701_v24 }
  0xf7   : > { %v1358_v57 = vpack.c.bf16 %v934_v53, %v933_v38  ;;  %v1398_v58 = vpack.c.bf16 %v950_v54, %v949_v41  ;;  %vm861_vm6 = vcmp.ge.f32.partialorder %v829_v49, 0.0  ;;  %v900_v59 = vmul.f32 %v1706_v26, %v829_v49  ;;  %v611_v60 = vpop.f32.mrf.mxu0  ;;  %v675_v61 = vpop.f32.mrf.mxu1 }
  0xf8   : > { %vm877_vm7 = vcmp.ge.f32.partialorder %v845_v50, 0.0  ;;  %v916_v62 = vmul.f32 %v1706_v26, %v845_v50  ;;  %vm866_vm8 = vcmp.ge.f32.partialorder %v834_v55, 0.0  ;;  %v905_v63 = vmul.f32 %v1706_v26, %v834_v55 }
  0xf9   : > { %1430 = vst [vmem:[%s1727_s24 + $0x8] sm:$0xff] %v1358_v57   ;;  %1438 = vst [vmem:[%s1727_s24 + $0x48] sm:$0xff] %v1398_v58   ;;  %v932_v1 = vsel %vm861_vm6, %v829_v49, %v900_v59  ;;  %v921_v2 = vmul.f32 %v1706_v26, %v850_v56  ;;  %v832_v3 = vadd.f32 %v1701_v24, %v611_v60  ;;  %v1492_v4 = vpop.f32.mrf.mxu0  ;;  %v1508_v5 = vpop.f32.mrf.mxu1  ;;  %vm882_vm9 = vcmp.ge.f32.partialorder %v850_v56, 0.0 }
  0xfa   : > { %v1353_v6 = vpack.c.bf16 %v932_v1, %v931_v47  ;;  %v948_v7 = vsel %vm877_vm7, %v845_v50, %v916_v62  ;;  %v848_v8 = vadd.f32 %v1701_v24, %v675_v61  ;;  %v937_v10 = vsel %vm866_vm8, %v834_v55, %v905_v63 }
  0xfb   : > { %v1393_v9 = vpack.c.bf16 %v948_v7, %v947_v0  ;;  %vm864_vm10 = vcmp.ge.f32.partialorder %v832_v3, 0.0  ;;  %v903_v11 = vmul.f32 %v1706_v26, %v832_v3  ;;  %v614_v12 = vpop.f32.mrf.mxu0  ;;  %v678_v13 = vpop.f32.mrf.mxu1  ;;  %v835_v15 = vadd.f32 %v1492_v4, %v1701_v24 }
  0xfc   : > { %1354 = vst [vmem:[%s1727_s24] sm:$0xff] %v1353_v6   ;;  %vm880_vm11 = vcmp.ge.f32.partialorder %v848_v8, 0.0  ;;  %v919_v14 = vmul.f32 %v1706_v26, %v848_v8  ;;  %v851_v16 = vadd.f32 %v1508_v5, %v1701_v24  ;;  %v953_v17 = vsel %vm882_vm9, %v850_v56, %v921_v2 }
  0xfd   : > { %1437 = vst [vmem:[%s1727_s24 + $0x40] sm:$0xff] %v1393_v9   ;;  %v935_v18 = vsel %vm864_vm10, %v832_v3, %v903_v11  ;;  %v833_v19 = vadd.f32 %v1701_v24, %v614_v12  ;;  %v849_v20 = vadd.f32 %v1701_v24, %v678_v13  ;;  %v1495_v21 = vpop.f32.mrf.mxu0  ;;  %v1511_v22 = vpop.f32.mrf.mxu1  ;;  %vm867_vm12 = vcmp.ge.f32.partialorder %v835_v15, 0.0 }
  0xfe   : > { %v951_v23 = vsel %vm880_vm11, %v848_v8, %v919_v14  ;;  %v906_v25 = vmul.f32 %v1706_v26, %v835_v15  ;;  %vm883_vm13 = vcmp.ge.f32.partialorder %v851_v16, 0.0  ;;  %v922_v27 = vmul.f32 %v1706_v26, %v851_v16 }
  0xff   : > { %vm865_vm14 = vcmp.ge.f32.partialorder %v833_v19, 0.0  ;;  %v904_v28 = vmul.f32 %v1706_v26, %v833_v19  ;;  %vm881_vm15 = vcmp.ge.f32.partialorder %v849_v20, 0.0  ;;  %v627_v29 = vpop.f32.mrf.mxu0  ;;  %v691_v30 = vpop.f32.mrf.mxu1  ;;  %v920_v32 = vmul.f32 %v1706_v26, %v849_v20 }
 0x100   : > { %v938_v31 = vsel %vm867_vm12, %v835_v15, %v906_v25  ;;  %v838_v33 = vadd.f32 %v1495_v21, %v1701_v24  ;;  %v854_v34 = vadd.f32 %v1511_v22, %v1701_v24  ;;  %v954_v36 = vsel %vm883_vm13, %v851_v16, %v922_v27 }
 0x101   : > { %v1368_v35 = vpack.c.bf16 %v938_v31, %v937_v10  ;;  %v936_v37 = vsel %vm865_vm14, %v833_v19, %v904_v28  ;;  %v836_v38 = vadd.f32 %v1701_v24, %v627_v29  ;;  %v1496_v39 = vpop.f32.mrf.mxu0  ;;  %v1512_v40 = vpop.f32.mrf.mxu1  ;;  %v1408_v41 = vpack.c.bf16 %v954_v36, %v953_v17 }
 0x102   : > { %v1363_v42 = vpack.c.bf16 %v936_v37, %v935_v18  ;;  %v952_v43 = vsel %vm881_vm15, %v849_v20, %v920_v32  ;;  %vm870_vm0 = vcmp.ge.f32.partialorder %v838_v33, 0.0  ;;  %v909_v45 = vmul.f32 %v1706_v26, %v838_v33 }
 0x103   : > { %1432 = vst [vmem:[%s1727_s24 + $0x18] sm:$0xff] %v1368_v35   ;;  %v1403_v44 = vpack.c.bf16 %v952_v43, %v951_v23  ;;  %vm886_vm1 = vcmp.ge.f32.partialorder %v854_v34, 0.0  ;;  %v925_v46 = vmul.f32 %v1706_v26, %v854_v34  ;;  %v630_v47 = vpop.f32.mrf.mxu0  ;;  %v694_v48 = vpop.f32.mrf.mxu1  ;;  %1440 = vst [vmem:[%s1727_s24 + $0x58] sm:$0xff] %v1408_v41   ;;  %vm868_vm2 = vcmp.ge.f32.partialorder %v836_v38, 0.0 }
 0x104   : > { %1431 = vst [vmem:[%s1727_s24 + $0x10] sm:$0xff] %v1363_v42   ;;  %v907_v49 = vmul.f32 %v1706_v26, %v836_v38  ;;  %v852_v50 = vadd.f32 %v1701_v24, %v691_v30  ;;  %v839_v51 = vadd.f32 %v1496_v39, %v1701_v24  ;;  %v941_v52 = vsel %vm870_vm0, %v838_v33, %v909_v45 }
 0x105   : > { %1439 = vst [vmem:[%s1727_s24 + $0x50] sm:$0xff] %v1403_v44   ;;  %v855_v53 = vadd.f32 %v1512_v40, %v1701_v24  ;;  %v837_v54 = vadd.f32 %v1701_v24, %v630_v47  ;;  %v1499_v55 = vpop.f32.mrf.mxu0  ;;  %v1515_v56 = vpop.f32.mrf.mxu1  ;;  %v957_v57 = vsel %vm886_vm1, %v854_v34, %v925_v46  ;;  %v853_v1 = vadd.f32 %v1701_v24, %v694_v48 }
 0x106   : > { %v939_v58 = vsel %vm868_vm2, %v836_v38, %v907_v49  ;;  %vm884_vm3 = vcmp.ge.f32.partialorder %v852_v50, 0.0  ;;  %vm871_vm4 = vcmp.ge.f32.partialorder %v839_v51, 0.0  ;;  %v910_v59 = vmul.f32 %v1706_v26, %v839_v51 }
 0x107   : > { %vm887_vm5 = vcmp.ge.f32.partialorder %v855_v53, 0.0  ;;  %v926_v60 = vmul.f32 %v1706_v26, %v855_v53  ;;  %vm869_vm6 = vcmp.ge.f32.partialorder %v837_v54, 0.0  ;;  %v643_v61 = vpop.f32.mrf.mxu0  ;;  %v707_v62 = vpop.f32.mrf.mxu1  ;;  %v923_v63 = vmul.f32 %v1706_v26, %v852_v50 }
 0x108   : > { %v908_v0 = vmul.f32 %v1706_v26, %v837_v54  ;;  %v842_v2 = vadd.f32 %v1499_v55, %v1701_v24  ;;  %v942_v3 = vsel %vm871_vm4, %v839_v51, %v910_v59  ;;  %v858_v5 = vadd.f32 %v1515_v56, %v1701_v24 }
 0x109   : > { %v958_v4 = vsel %vm887_vm5, %v855_v53, %v926_v60  ;;  %v840_v6 = vadd.f32 %v1701_v24, %v643_v61  ;;  %v1500_v7 = vpop.f32.mrf.mxu0  ;;  %v1516_v8 = vpop.f32.mrf.mxu1  ;;  %v1378_v9 = vpack.c.bf16 %v942_v3, %v941_v52  ;;  %vm885_vm7 = vcmp.ge.f32.partialorder %v853_v1, 0.0 }
 0x10a   : > { %v1418_v10 = vpack.c.bf16 %v958_v4, %v957_v57  ;;  %v940_v11 = vsel %vm869_vm6, %v837_v54, %v908_v0  ;;  %v924_v13 = vmul.f32 %v1706_v26, %v853_v1  ;;  %v913_v14 = vmul.f32 %v1706_v26, %v842_v2 }
 0x10b   : > { %v1373_v12 = vpack.c.bf16 %v940_v11, %v939_v58  ;;  %v955_v15 = vsel %vm884_vm3, %v852_v50, %v923_v63  ;;  %1434 = vst [vmem:[%s1727_s24 + $0x28] sm:$0xff] %v1378_v9   ;;  %vm874_vm8 = vcmp.ge.f32.partialorder %v842_v2, 0.0  ;;  %v929_v17 = vmul.f32 %v1706_v26, %v858_v5  ;;  %v646_v20 = vpop.f32.mrf.mxu0  ;;  %v710_v21 = vpop.f32.mrf.mxu1 }
 0x10c   : > { %1442 = vst [vmem:[%s1727_s24 + $0x68] sm:$0xff] %v1418_v10   ;;  %v956_v16 = vsel %vm885_vm7, %v853_v1, %v924_v13  ;;  %v856_v18 = vadd.f32 %v1701_v24, %v707_v62  ;;  %v843_v19 = vadd.f32 %v1500_v7, %v1701_v24  ;;  %vm890_vm9 = vcmp.ge.f32.partialorder %v858_v5, 0.0 }
 0x10d   : > { %1433 = vst [vmem:[%s1727_s24 + $0x20] sm:$0xff] %v1373_v12   ;;  %v1413_v22 = vpack.c.bf16 %v956_v16, %v955_v15  ;;  %vm872_vm10 = vcmp.ge.f32.partialorder %v840_v6, 0.0  ;;  %v859_v23 = vadd.f32 %v1516_v8, %v1701_v24  ;;  %v945_v25 = vsel %vm874_vm8, %v842_v2, %v913_v14 }
 0x10e   : > { %v911_v27 = vmul.f32 %v1706_v26, %v840_v6  ;;  %vm875_vm11 = vcmp.ge.f32.partialorder %v843_v19, 0.0  ;;  %v914_v28 = vmul.f32 %v1706_v26, %v843_v19  ;;  %v841_v30 = vadd.f32 %v1701_v24, %v646_v20 }
 0x10f   : > { %1441 = vst [vmem:[%s1727_s24 + $0x60] sm:$0xff] %v1413_v22   ;;  %vm891_vm12 = vcmp.ge.f32.partialorder %v859_v23, 0.0  ;;  %v930_v29 = vmul.f32 %v1706_v26, %v859_v23  ;;  %v857_v31 = vadd.f32 %v1701_v24, %v710_v21  ;;  %v961_v32 = vsel %vm890_vm9, %v858_v5, %v929_v17 }
 0x110   : > { %vm888_vm13 = vcmp.ge.f32.partialorder %v856_v18, 0.0  ;;  %v927_v33 = vmul.f32 %v1706_v26, %v856_v18  ;;  %v946_v34 = vsel %vm875_vm11, %v843_v19, %v914_v28  ;;  %vm873_vm14 = vcmp.ge.f32.partialorder %v841_v30, 0.0 }
 0x111   : > { %v1388_v35 = vpack.c.bf16 %v946_v34, %v945_v25  ;;  %v962_v36 = vsel %vm891_vm12, %v859_v23, %v930_v29  ;;  %v912_v37 = vmul.f32 %v1706_v26, %v841_v30  ;;  %vm889_vm15 = vcmp.ge.f32.partialorder %v857_v31, 0.0 }
 0x112   : > { %v1428_v38 = vpack.c.bf16 %v962_v36, %v961_v32  ;;  %v928_v39 = vmul.f32 %v1706_v26, %v857_v31  ;;  %v943_v40 = vsel %vm872_vm10, %v840_v6, %v911_v27  ;;  %v959_v41 = vsel %vm888_vm13, %v856_v18, %v927_v33 }
 0x113   : > { %1436 = vst [vmem:[%s1727_s24 + $0x38] sm:$0xff] %v1388_v35   ;;  %v944_v24 = vsel %vm873_vm14, %v841_v30, %v912_v37 }
 0x114   : > { %1444 = vst [vmem:[%s1727_s24 + $0x78] sm:$0xff] %v1428_v38   ;;  %v1383_v42 = vpack.c.bf16 %v944_v24, %v943_v40  ;;  %v960_v43 = vsel %vm889_vm15, %v857_v31, %v928_v39 }
 0x115   : > { %v1423_v44 = vpack.c.bf16 %v960_v43, %v959_v41 }
 0x116   : > { %1435 = vst [vmem:[%s1727_s24 + $0x30] sm:$0xff] %v1383_v42  }
 0x117   : > { %1443 = vst [vmem:[%s1727_s24 + $0x70] sm:$0xff] %v1423_v44  }
 0x118 PF: > { %s14_s17 = sadd.s32 1, %s1603_s17   ;;  %s1813_s15 = smov %s1599_s16 }
 0x119   : > { %p11_p5 = scmp.ge.s32.totalorder %s14_s17, 4   ;;  %s1814_s16 = smov %s1816_s18 }
 0x11b   :  { %13 = sbr.rel (!%p11_p5) target bundleno = 2 (0x2), region = 83 }

// kernel: coarse_forward.3
= control target key start
LH: loop header
LB: loop body
LE: loop exit
PB: predicated region body
PF: predicated region fallthrough
CT: control target
= control target key end

     0   :  { %s2748_s15 = smov 0   ;;  %s2750_s16 = smov 0   ;;  %s3332_s0 = inlined_call_operand.vmem [shape: bf16[512,640], index: 0, kind: input, shape index: {}]   ;;  %s3333_s1 = inlined_call_operand.vmem [shape: bf16[640,128], index: 1, kind: input, shape index: {}]   ;;  %s3334_s2 = inlined_call_operand.vmem [shape: f32[1,128], index: 2, kind: input, shape index: {}]   ;;  %s3335_s3 = inlined_call_operand.vmem [shape: f32[512,128], index: 3, kind: input, shape index: {}]   ;;  %s3336_s4 = inlined_call_operand.vmem [shape: f32[512,128], index: 4, kind: output, shape index: {}]  }
   0x1   :  { %s2752_s17 = smov 0  }
   0x2 LB: > { %s33_s18 = sadd.s32 1, %s2717_s16  ;;  %p2080_p0 = scmp.ge.s32.totalorder %s2721_s17, 1  ;;  %s2721_s17 = sphi %s2752_s17, %s14_s17   ;;  %s2717_s16 = sphi %s2750_s16, %s3378_s16   ;;  %s2713_s15 = sphi %s2748_s15, %s3377_s15  }
   0x3   : > { %p35_p1 = scmp.ge.s32.totalorder %s33_s18, 2  ;;  %p232_p2 = scmp.lt.s32.totalorder %s2721_s17, 3 }
   0x5   : > { %s3380_s18 = smov (%p35_p1, %s33_s18), 0  ;;  %p233_p3 = pnand %p2080_p0, %p232_p2 }
   0x7   : > { %236 = sbr.rel (%p233_p3) target bundleno = 407 (0x197), region = 36 }
   0xc   : > { %v2547_v0 = vld [vmem:[%s3333_s1 + $0x78] sm:$0xff]   ;;  %s2081_s21 = sshll.u32 %s2713_s15, 5  ;;  %v2549_v2 = vld [vmem:[%s3333_s1 + $0x70] sm:$0xff]   ;;  %v2551_v4 = vld [vmem:[%s3333_s1 + $0x68] sm:$0xff]  }
   0xd   : > { %v2548_v1 = vld [vmem:[%s3333_s1 + $0x38] sm:$0xff]   ;;  %2210 = vmatprep.subr.bf16.mxu0 %v2547_v0  ;;  %2506 = vmatprep.subr.bf16.mxu1 %v2547_v0  ;;  %p287_p4 = scmp.lt.s32.totalorder %s2081_s21, 63  ;;  %v2550_v3 = vld [vmem:[%s3333_s1 + $0x30] sm:$0xff]   ;;  %v2552_v5 = vld [vmem:[%s3333_s1 + $0x28] sm:$0xff]  }
   0xe   : > { %2211 = vmatpush3.bf16.msra.mxu0 %v2548_v1  ;;  %2514 = vmatpush3.bf16.msra.mxu1 %v2548_v1  ;;  %v2553_v6 = vld [vmem:[%s3333_s1 + $0x60] sm:$0xff]   ;;  %v2555_v8 = vld [vmem:[%s3333_s1 + $0x58] sm:$0xff]   ;;  %v2557_v10 = vld [vmem:[%s3333_s1 + $0x50] sm:$0xff]  }
   0xf   : > { %2212 = vmatprep.subr.bf16.mxu0 %v2549_v2  ;;  %2507 = vmatprep.subr.bf16.mxu1 %v2549_v2  ;;  %s3382_s21 = smov (!%p287_p4, %s2081_s21), 63  ;;  %v2554_v7 = vld [vmem:[%s3333_s1 + $0x20] sm:$0xff]   ;;  %v2556_v9 = vld [vmem:[%s3333_s1 + $0x18] sm:$0xff]   ;;  %v2558_v13 = vld [vmem:[%s3333_s1 + $0x10] sm:$0xff]  }
  0x10   : > { %s2522_s8 = smul.u32 20, %s3382_s21  ;;  %v2559_v14 = vld [vmem:[%s3333_s1 + $0x48] sm:$0xff]   ;;  %v2561_v16 = vld [vmem:[%s3333_s1 + $0x40] sm:$0xff]   ;;  %v2569_v18 = vld [vmem:[%s3333_s1 + $0xf8] sm:$0xff]  }
  0x11   : > { %v2560_v15 = vld [vmem:[%s3333_s1 + $0x8] sm:$0xff]   ;;  %v2562_v17 = vld [vmem:[%s3333_s1] sm:$0xff]   ;;  %v2572_v19 = vld [vmem:[%s3333_s1 + $0x138] sm:$0xff]  }
  0x12   : > { %2213 = vmatpush3.bf16.msra.mxu0 %v2550_v3  ;;  %2515 = vmatpush3.bf16.msra.mxu1 %v2550_v3  ;;  %s2799_s15 = scalar_lea.vmem %s3332_s0, %s2522_s8  ;;  %v2570_v22 = vld [vmem:[%s3333_s1 + $0xb8] sm:$0xff]   ;;  %v2571_v23 = vld [vmem:[%s3333_s1 + $0xf0] sm:$0xff]   ;;  %v2580_v29 = vld [vmem:[%s3333_s1 + $0xe8] sm:$0xff]  }
  0x13   : > { %2214 = vmatprep.subr.bf16.mxu0 %v2551_v4  ;;  %2508 = vmatprep.subr.bf16.mxu1 %v2551_v4  ;;  %v2565_v11 = vld [vmem:[%s2799_s15 + $0x4] ss:$20 sps:$4 sm:$0xff]   ;;  %v2563_v20 = vld [vmem:[%s2799_s15] ss:$20 sps:$4 sm:$0xff]   ;;  %v2578_v28 = vld [vmem:[%s2799_s15 + $0x28] ss:$20 sps:$4 sm:$0xff]  }
  0x14   : > { %v2568_v12 = vld [vmem:[%s2799_s15 + $0x1e4] ss:$20 sps:$4 sm:$0xff]   ;;  %1260 = vmatprep.mubr.bf16.mxu0 %v2565_v11  ;;  %v2566_v21 = vld [vmem:[%s2799_s15 + $0x1e0] ss:$20 sps:$4 sm:$0xff]   ;;  %v2579_v30 = vld [vmem:[%s2799_s15 + $0x208] ss:$20 sps:$4 sm:$0xff]  }
  0x15   : > { %1356 = vmatprep.mubr.bf16.mxu1 %v2568_v12  ;;  %v2574_v24 = vld [vmem:[%s2799_s15 + $0x2c] ss:$20 sps:$4 sm:$0xff]   ;;  %v2591_v26 = vld [vmem:[%s3333_s1 + $0x130] sm:$0xff]   ;;  %v2590_v36 = vld [vmem:[%s3333_s1 + $0xd8] sm:$0xff]  }
  0x16   : > { %2215 = vmatpush3.bf16.msra.mxu0 %v2552_v5  ;;  %2516 = vmatpush3.bf16.msra.mxu1 %v2552_v5  ;;  %v2576_v25 = vld [vmem:[%s2799_s15 + $0x20c] ss:$20 sps:$4 sm:$0xff]   ;;  %v2573_v27 = vld [vmem:[%s3333_s1 + $0xb0] sm:$0xff]   ;;  %v2592_v40 = vld [vmem:[%s3333_s1 + $0x98] sm:$0xff]  }
  0x17   : > { %2216 = vmatprep.subr.bf16.mxu0 %v2553_v6  ;;  %2509 = vmatprep.subr.bf16.mxu1 %v2553_v6  ;;  %v2581_v31 = vld [vmem:[%s3333_s1 + $0xa8] sm:$0xff]   ;;  %v2582_v33 = vld [vmem:[%s3333_s1 + $0xe0] sm:$0xff]   ;;  %v2593_v41 = vld [vmem:[%s3333_s1 + $0xd0] sm:$0xff]  }
  0x18   : > { %v2584_v32 = vld [vmem:[%s2799_s15 + $0x54] ss:$20 sps:$4 sm:$0xff]   ;;  %v2583_v35 = vld [vmem:[%s3333_s1 + $0xa0] sm:$0xff]   ;;  %v2595_v42 = vld [vmem:[%s2799_s15 + $0x7c] ss:$20 sps:$4 sm:$0xff]  }
  0x19   : > { %v2586_v34 = vld [vmem:[%s2799_s15 + $0x234] ss:$20 sps:$4 sm:$0xff]   ;;  %v2588_v37 = vld [vmem:[%s2799_s15 + $0x50] ss:$20 sps:$4 sm:$0xff]   ;;  %v2599_v46 = vld [vmem:[%s2799_s15 + $0x78] ss:$20 sps:$4 sm:$0xff]  }
  0x1a   : > { %2217 = vmatpush3.bf16.msra.mxu0 %v2554_v7  ;;  %2517 = vmatpush3.bf16.msra.mxu1 %v2554_v7  ;;  %v2604_v38 = vld [vmem:[%s3333_s1 + $0x128] sm:$0xff]   ;;  %v2589_v39 = vld [vmem:[%s2799_s15 + $0x230] ss:$20 sps:$4 sm:$0xff]   ;;  %v2625_v52 = vld [vmem:[%s3333_s1 + $0x118] sm:$0xff]  }
  0x1b   : > { %2218 = vmatprep.subr.bf16.mxu0 %v2555_v8  ;;  %2510 = vmatprep.subr.bf16.mxu1 %v2555_v8  ;;  %v2597_v43 = vld [vmem:[%s2799_s15 + $0x25c] ss:$20 sps:$4 sm:$0xff]   ;;  %v2618_v45 = vld [vmem:[%s3333_s1 + $0x120] sm:$0xff]   ;;  %v2600_v47 = vld [vmem:[%s2799_s15 + $0x258] ss:$20 sps:$4 sm:$0xff]  }
  0x1c   : > { %v2594_v44 = vld [vmem:[%s3333_s1 + $0x90] sm:$0xff]   ;;  %v2601_v48 = vld [vmem:[%s3333_s1 + $0xc8] sm:$0xff]   ;;  %v2603_v50 = vld [vmem:[%s3333_s1 + $0xc0] sm:$0xff]  }
  0x1d   : > { %v2602_v49 = vld [vmem:[%s3333_s1 + $0x88] sm:$0xff]   ;;  %v2606_v51 = vld [vmem:[%s2799_s15 + $0xa4] ss:$20 sps:$4 sm:$0xff]   ;;  %v2611_v56 = vld [vmem:[%s2799_s15 + $0xa0] ss:$20 sps:$4 sm:$0xff]  }
  0x1e   : > { %2219 = vmatpush3.bf16.msra.mxu0 %v2556_v9  ;;  %2518 = vmatpush3.bf16.msra.mxu1 %v2556_v9  ;;  %v2610_v53 = vld [vmem:[%s2799_s15 + $0xc] ss:$20 sps:$4 sm:$0xff]   ;;  %v2608_v55 = vld [vmem:[%s2799_s15 + $0x8] ss:$20 sps:$4 sm:$0xff]   ;;  %v2638_v57 = vld [vmem:[%s3333_s1 + $0x110] sm:$0xff]  }
  0x1f   : > { %2220 = vmatprep.subr.bf16.mxu0 %v2557_v10  ;;  %2511 = vmatprep.subr.bf16.mxu1 %v2557_v10  ;;  %v2605_v54 = vld [vmem:[%s3333_s1 + $0x80] sm:$0xff]   ;;  %v2614_v59 = vld [vmem:[%s2799_s15 + $0x34] ss:$20 sps:$4 sm:$0xff]   ;;  %v2621_v0 = vld [vmem:[%s2799_s15 + $0x5c] ss:$20 sps:$4 sm:$0xff]  }
  0x20   : > { %v2612_v58 = vld [vmem:[%s2799_s15 + $0xcc] ss:$20 sps:$4 sm:$0xff]   ;;  %v2616_v61 = vld [vmem:[%s2799_s15 + $0xc8] ss:$20 sps:$4 sm:$0xff]   ;;  %v2617_v62 = vld [vmem:[%s2799_s15 + $0x30] ss:$20 sps:$4 sm:$0xff]  }
  0x21   : > { %v2645_v60 = vld [vmem:[%s3333_s1 + $0x108] sm:$0xff]   ;;  %v2658_v1 = vld [vmem:[%s3333_s1 + $0x100] sm:$0xff]   ;;  %v2626_v4 = vld [vmem:[%s2799_s15 + $0x11c] ss:$20 sps:$4 sm:$0xff]  }
  0x22   : > { %2221 = vmatpush3.bf16.msra.mxu0 %v2558_v13  ;;  %2519 = vmatpush3.bf16.msra.mxu1 %v2558_v13  ;;  %v2619_v63 = vld [vmem:[%s2799_s15 + $0xf4] ss:$20 sps:$4 sm:$0xff]   ;;  %v2623_v2 = vld [vmem:[%s2799_s15 + $0xf0] ss:$20 sps:$4 sm:$0xff]   ;;  %v2624_v3 = vld [vmem:[%s2799_s15 + $0x58] ss:$20 sps:$4 sm:$0xff]  }
  0x23   : > { %2222 = vmatprep.subr.bf16.mxu0 %v2559_v14  ;;  %2512 = vmatprep.subr.bf16.mxu1 %v2559_v14  ;;  %v2628_v5 = vld [vmem:[%s2799_s15 + $0x84] ss:$20 sps:$4 sm:$0xff]   ;;  %v2631_v7 = vld [vmem:[%s2799_s15 + $0x80] ss:$20 sps:$4 sm:$0xff]   ;;  %v2637_v11 = vld [vmem:[%s2799_s15 + $0xa8] ss:$20 sps:$4 sm:$0xff]  }
  0x24   : > { %v2630_v6 = vld [vmem:[%s2799_s15 + $0x118] ss:$20 sps:$4 sm:$0xff]   ;;  %v2636_v10 = vld [vmem:[%s2799_s15 + $0x140] ss:$20 sps:$4 sm:$0xff]   ;;  %v2643_v14 = vld [vmem:[%s2799_s15 + $0x168] ss:$20 sps:$4 sm:$0xff]  }
  0x25   : > { %v2632_v8 = vld [vmem:[%s2799_s15 + $0x144] ss:$20 sps:$4 sm:$0xff]   ;;  %v2634_v9 = vld [vmem:[%s2799_s15 + $0xac] ss:$20 sps:$4 sm:$0xff]   ;;  %v2641_v13 = vld [vmem:[%s2799_s15 + $0xd4] ss:$20 sps:$4 sm:$0xff]  }
  0x26   : > { %2223 = vmatpush3.bf16.msra.mxu0 %v2560_v15  ;;  %2520 = vmatpush3.bf16.msra.mxu1 %v2560_v15  ;;  %v2639_v12 = vld [vmem:[%s2799_s15 + $0x16c] ss:$20 sps:$4 sm:$0xff]   ;;  %v2644_v15 = vld [vmem:[%s2799_s15 + $0xd0] ss:$20 sps:$4 sm:$0xff]  }
  0x27   : > { %2224 = vmatprep.subr.bf16.mxu0 %v2561_v16  ;;  %2513 = vmatprep.subr.bf16.mxu1 %v2561_v16  ;;  %v2646_v16 = vld [vmem:[%s2799_s15 + $0x194] ss:$20 sps:$4 sm:$0xff]  }
  0x2a   : > { %2225 = vmatpush3.bf16.msra.mxu0 %v2562_v17  ;;  %2521 = vmatpush3.bf16.msra.mxu1 %v2562_v17  ;;  %v2648_v17 = vld [vmem:[%s2799_s15 + $0xfc] ss:$20 sps:$4 sm:$0xff]  }
  0x2b   : > { %2322 = vmatprep.subr.bf16.mxu1 %v2569_v18  ;;  %2458 = vmatprep.subr.bf16.mxu0 %v2572_v19  ;;  %v2650_v18 = vld [vmem:[%s2799_s15 + $0x190] ss:$20 sps:$4 sm:$0xff]  }
  0x2d   : > { %1261 = vmatmul.mubr.bf16.vlgmr.msra.gmra.mxu0 %v2563_v20  ;;  %1357 = vmatmul.mubr.bf16.vlgmr.msra.gmra.mxu1 %v2566_v21  ;;  %v2652_v20 = vld [vmem:[%s2799_s15 + $0x1bc] ss:$20 sps:$4 sm:$0xff]   ;;  %v2654_v21 = vld [vmem:[%s2799_s15 + $0x124] ss:$20 sps:$4 sm:$0xff]  }
  0x2e   : > { %2323 = vmatpush3.bf16.msra.mxu1 %v2570_v22  ;;  %2459 = vmatpush3.bf16.msra.mxu0 %v2572_v19  ;;  %v2651_v19 = vld [vmem:[%s2799_s15 + $0xf8] ss:$20 sps:$4 sm:$0xff]  }
  0x2f   : > { %2324 = vmatprep.subr.bf16.mxu1 %v2571_v23  ;;  %1268 = vmatprep.mubr.bf16.mxu0 %v2574_v24  ;;  %v2656_v22 = vld [vmem:[%s2799_s15 + $0x1b8] ss:$20 sps:$4 sm:$0xff]   ;;  %v2657_v23 = vld [vmem:[%s2799_s15 + $0x120] ss:$20 sps:$4 sm:$0xff]  }
  0x30   : > { %1364 = vmatprep.mubr.bf16.mxu1 %v2576_v25  ;;  %2460 = vmatprep.subr.bf16.mxu0 %v2591_v26  ;;  %v2659_v24 = vld [vmem:[%s2799_s15 + $0x14c] ss:$20 sps:$4 sm:$0xff]   ;;  %v2661_v25 = vld [vmem:[%s2799_s15 + $0x10] ss:$20 sps:$4 sm:$0xff]  }
  0x32   : > { %2325 = vmatpush3.bf16.msra.mxu1 %v2573_v27  ;;  %2461 = vmatpush3.bf16.msra.mxu0 %v2591_v26  ;;  %v2662_v26 = vld [vmem:[%s2799_s15 + $0x148] ss:$20 sps:$4 sm:$0xff]   ;;  %v2663_v27 = vld [vmem:[%s2799_s15 + $0x38] ss:$20 sps:$4 sm:$0xff]  }
  0x33   : > { %2326 = vmatprep.subr.bf16.mxu1 %v2580_v29  ;;  %2462 = vmatprep.subr.bf16.mxu0 %v2604_v38  ;;  %v2666_v29 = vld [vmem:[%s2799_s15 + $0x60] ss:$20 sps:$4 sm:$0xff]  }
  0x35   : > { %1269 = vmatmul.mubr.bf16.gmra.mxu0 %v2578_v28  ;;  %1365 = vmatmul.mubr.bf16.gmra.mxu1 %v2579_v30  ;;  %v2664_v28 = vld [vmem:[%s2799_s15 + $0x174] ss:$20 sps:$4 sm:$0xff]   ;;  %v2667_v30 = vld [vmem:[%s2799_s15 + $0x170] ss:$20 sps:$4 sm:$0xff]  }
  0x36   : > { %2327 = vmatpush3.bf16.msra.mxu1 %v2581_v31  ;;  %1276 = vmatprep.mubr.bf16.mxu0 %v2584_v32  ;;  %v2668_v31 = vld [vmem:[%s2799_s15 + $0x88] ss:$20 sps:$4 sm:$0xff]  }
  0x37   : > { %2328 = vmatprep.subr.bf16.mxu1 %v2582_v33  ;;  %1372 = vmatprep.mubr.bf16.mxu1 %v2586_v34  ;;  %v2669_v32 = vld [vmem:[%s2799_s15 + $0x19c] ss:$20 sps:$4 sm:$0xff]   ;;  %v2672_v34 = vld [vmem:[%s2799_s15 + $0x198] ss:$20 sps:$4 sm:$0xff]  }
  0x38   : > { %2463 = vmatpush3.bf16.msra.mxu0 %v2604_v38  ;;  %v2671_v33 = vld [vmem:[%s2799_s15 + $0xb0] ss:$20 sps:$4 sm:$0xff]   ;;  %v2677_v38 = vld [vmem:[%s2799_s15 + $0x1c0] ss:$20 sps:$4 sm:$0xff]  }
  0x39   : > { %2464 = vmatprep.subr.bf16.mxu0 %v2618_v45 }
  0x3a   : > { %2329 = vmatpush3.bf16.msra.mxu1 %v2583_v35  ;;  %v2673_v35 = vld [vmem:[%s2799_s15 + $0xd8] ss:$20 sps:$4 sm:$0xff]  }
  0x3b   : > { %2330 = vmatprep.subr.bf16.mxu1 %v2590_v36  ;;  %v2674_v36 = vld [vmem:[%s2799_s15 + $0x1c4] ss:$20 sps:$4 sm:$0xff]  }
  0x3c   : > { %2465 = vmatpush3.bf16.msra.mxu0 %v2618_v45  ;;  %v2686_v45 = vld [vmem:[%s2799_s15 + $0x1a0] ss:$20 sps:$4 sm:$0xff]  }
  0x3d   : > { %1277 = vmatmul.mubr.bf16.gmra.mxu0 %v2588_v37  ;;  %1373 = vmatmul.mubr.bf16.gmra.mxu1 %v2589_v39  ;;  %v2676_v37 = vld [vmem:[%s2799_s15 + $0x100] ss:$20 sps:$4 sm:$0xff]   ;;  %v2678_v39 = vld [vmem:[%s2799_s15 + $0x128] ss:$20 sps:$4 sm:$0xff]  }
  0x3e   : > { %2331 = vmatpush3.bf16.msra.mxu1 %v2592_v40  ;;  %1284 = vmatprep.mubr.bf16.mxu0 %v2595_v42  ;;  %v2679_v40 = vld [vmem:[%s2799_s15 + $0x1ec] ss:$20 sps:$4 sm:$0xff]   ;;  %v2682_v42 = vld [vmem:[%s2799_s15 + $0x1e8] ss:$20 sps:$4 sm:$0xff]  }
  0x3f   : > { %2332 = vmatprep.subr.bf16.mxu1 %v2593_v41  ;;  %1380 = vmatprep.mubr.bf16.mxu1 %v2597_v43  ;;  %v2681_v41 = vld [vmem:[%s2799_s15 + $0x150] ss:$20 sps:$4 sm:$0xff]   ;;  %v2683_v43 = vld [vmem:[%s2799_s15 + $0x178] ss:$20 sps:$4 sm:$0xff]  }
  0x40   : > { %2466 = vmatprep.subr.bf16.mxu0 %v2625_v52 }
  0x41   : > { %2467 = vmatpush3.bf16.msra.mxu0 %v2625_v52  ;;  %v2694_v52 = vld [vmem:[%s2799_s15 + $0x264] ss:$20 sps:$4 sm:$0xff]  }
  0x42   : > { %2333 = vmatpush3.bf16.msra.mxu1 %v2594_v44  ;;  %2468 = vmatprep.subr.bf16.mxu0 %v2638_v57  ;;  %v2684_v44 = vld [vmem:[%s2799_s15 + $0x214] ss:$20 sps:$4 sm:$0xff]  }
  0x43   : > { %2334 = vmatprep.subr.bf16.mxu1 %v2601_v48  ;;  %v2689_v48 = vld [vmem:[%s2799_s15 + $0x23c] ss:$20 sps:$4 sm:$0xff]  }
  0x45   : > { %1285 = vmatmul.mubr.bf16.gmra.mxu0 %v2599_v46  ;;  %1381 = vmatmul.mubr.bf16.gmra.mxu1 %v2600_v47  ;;  %v2687_v46 = vld [vmem:[%s2799_s15 + $0x210] ss:$20 sps:$4 sm:$0xff]   ;;  %v2688_v47 = vld [vmem:[%s2799_s15 + $0x1c8] ss:$20 sps:$4 sm:$0xff]  }
  0x46   : > { %2335 = vmatpush3.bf16.msra.mxu1 %v2602_v49  ;;  %1292 = vmatprep.mubr.bf16.mxu0 %v2606_v51  ;;  %v2691_v49 = vld [vmem:[%s2799_s15 + $0x1f0] ss:$20 sps:$4 sm:$0xff]   ;;  %v2693_v51 = vld [vmem:[%s2799_s15 + $0x218] ss:$20 sps:$4 sm:$0xff]  }
  0x47   : > { %2336 = vmatprep.subr.bf16.mxu1 %v2603_v50  ;;  %1421 = vmatprep.mubr.bf16.mxu1 %v2610_v53  ;;  %v2692_v50 = vld [vmem:[%s2799_s15 + $0x238] ss:$20 sps:$4 sm:$0xff]   ;;  %v2696_v53 = vld [vmem:[%s2799_s15 + $0x240] ss:$20 sps:$4 sm:$0xff]  }
  0x48   : > { %2469 = vmatpush3.bf16.msra.mxu0 %v2638_v57 }
  0x49   : > { %2470 = vmatprep.subr.bf16.mxu0 %v2645_v60 }
  0x4a   : > { %2337 = vmatpush3.bf16.msra.mxu1 %v2605_v54  ;;  %v2697_v54 = vld [vmem:[%s2799_s15 + $0x260] ss:$20 sps:$4 sm:$0xff]  }
  0x4c   : > { %2471 = vmatpush3.bf16.msra.mxu0 %v2645_v60 }
  0x4d   : > { %1293 = vmatmul.mubr.bf16.gmra.mxu0 %v2611_v56  ;;  %1422 = vmatmul.mubr.bf16.vlgmr.msra.gmra.mxu1 %v2608_v55  ;;  %v2698_v55 = vld [vmem:[%s2799_s15 + $0x268] ss:$20 sps:$4 sm:$0xff]   ;;  %s2084_s15 = sshll.u32 %s3382_s21, 3 }
  0x4e   : > { %1300 = vmatprep.mubr.bf16.mxu0 %v2612_v58  ;;  %1429 = vmatprep.mubr.bf16.mxu1 %v2614_v59  ;;  %s3114_s20 = scalar_lea.vmem %s3335_s3, %s2084_s15  ;;  %s3135_s25 = scalar_lea.vmem %s3336_s4, %s2084_s15 }
  0x4f   : > { %2472 = vmatprep.subr.bf16.mxu0 %v2658_v1 }
  0x50   : > { %2473 = vmatpush3.bf16.msra.mxu0 %v2658_v1 }
  0x55   : > { %1301 = vmatmul.mubr.bf16.gmra.mxu0 %v2616_v61  ;;  %1430 = vmatmul.mubr.bf16.gmra.mxu1 %v2617_v62 }
  0x56   : > { %1308 = vmatprep.mubr.bf16.mxu0 %v2619_v63  ;;  %1437 = vmatprep.mubr.bf16.mxu1 %v2621_v0 }
  0x5d   : > { %1309 = vmatmul.mubr.bf16.gmra.mxu0 %v2623_v2  ;;  %1438 = vmatmul.mubr.bf16.gmra.mxu1 %v2624_v3 }
  0x5e   : > { %1316 = vmatprep.mubr.bf16.mxu0 %v2626_v4  ;;  %1445 = vmatprep.mubr.bf16.mxu1 %v2628_v5 }
  0x65   : > { %1317 = vmatmul.mubr.bf16.gmra.mxu0 %v2630_v6  ;;  %1446 = vmatmul.mubr.bf16.gmra.mxu1 %v2631_v7 }
  0x66   : > { %1324 = vmatprep.mubr.bf16.mxu0 %v2632_v8  ;;  %1453 = vmatprep.mubr.bf16.mxu1 %v2634_v9 }
  0x6d   : > { %1325 = vmatmul.mubr.bf16.gmra.mxu0 %v2636_v10  ;;  %1454 = vmatmul.mubr.bf16.gmra.mxu1 %v2637_v11 }
  0x6e   : > { %1332 = vmatprep.mubr.bf16.mxu0 %v2639_v12  ;;  %1461 = vmatprep.mubr.bf16.mxu1 %v2641_v13 }
  0x75   : > { %1333 = vmatmul.mubr.bf16.gmra.mxu0 %v2643_v14  ;;  %1462 = vmatmul.mubr.bf16.gmra.mxu1 %v2644_v15 }
  0x76   : > { %1340 = vmatprep.mubr.bf16.mxu0 %v2646_v16  ;;  %1469 = vmatprep.mubr.bf16.mxu1 %v2648_v17 }
  0x7d   : > { %1341 = vmatmul.mubr.bf16.gmra.mxu0 %v2650_v18  ;;  %1470 = vmatmul.mubr.bf16.gmra.mxu1 %v2651_v19 }
  0x7e   : > { %1348 = vmatprep.mubr.bf16.mxu0 %v2652_v20  ;;  %1477 = vmatprep.mubr.bf16.mxu1 %v2654_v21 }
  0x85   : > { %1349 = vmatmul.mubr.bf16.gmra.mxu0 %v2656_v22  ;;  %1478 = vmatmul.mubr.bf16.gmra.mxu1 %v2657_v23 }
  0x86   : > { %1485 = vmatprep.mubr.bf16.mxu1 %v2659_v24  ;;  %2474 = vmatprep.mubr.bf16.mxu0 %v2661_v25 }
  0x8d   : > { %1486 = vmatmul.mubr.bf16.gmra.mxu1 %v2662_v26  ;;  %2475 = vmatmul.mubr.bf16.vlgmr.msra.gmra.mxu0 %v2663_v27 }
  0x8e   : > { %1493 = vmatprep.mubr.bf16.mxu1 %v2664_v28  ;;  %2478 = vmatprep.mubr.bf16.mxu0 %v2666_v29 }
  0x95   : > { %1494 = vmatmul.mubr.bf16.gmra.mxu1 %v2667_v30  ;;  %2479 = vmatmul.mubr.bf16.gmra.mxu0 %v2668_v31 }
  0x96   : > { %1501 = vmatprep.mubr.bf16.mxu1 %v2669_v32  ;;  %2482 = vmatprep.mubr.bf16.mxu0 %v2671_v33 }
  0x9d   : > { %1502 = vmatmul.mubr.bf16.gmra.mxu1 %v2672_v34  ;;  %2483 = vmatmul.mubr.bf16.gmra.mxu0 %v2673_v35 }
  0x9e   : > { %1509 = vmatprep.mubr.bf16.mxu1 %v2674_v36  ;;  %2486 = vmatprep.mubr.bf16.mxu0 %v2676_v37 }
  0xa5   : > { %1510 = vmatmul.mubr.bf16.gmra.mxu1 %v2677_v38  ;;  %2487 = vmatmul.mubr.bf16.gmra.mxu0 %v2678_v39 }
  0xa6   : > { %1517 = vmatprep.mubr.bf16.mxu1 %v2679_v40  ;;  %2490 = vmatprep.mubr.bf16.mxu0 %v2681_v41 }
  0xad   : > { %1518 = vmatmul.mubr.bf16.gmra.mxu1 %v2682_v42  ;;  %2491 = vmatmul.mubr.bf16.gmra.mxu0 %v2683_v43 }
  0xae   : > { %1525 = vmatprep.mubr.bf16.mxu1 %v2684_v44  ;;  %2494 = vmatprep.mubr.bf16.mxu0 %v2686_v45 }
  0xb5   : > { %1526 = vmatmul.mubr.bf16.gmra.mxu1 %v2687_v46  ;;  %2495 = vmatmul.mubr.bf16.gmra.mxu0 %v2688_v47 }
  0xb6   : > { %1533 = vmatprep.mubr.bf16.mxu1 %v2689_v48  ;;  %2498 = vmatprep.mubr.bf16.mxu0 %v2691_v49 }
  0xbd   : > { %1534 = vmatmul.mubr.bf16.gmra.mxu1 %v2692_v50  ;;  %2499 = vmatmul.mubr.bf16.gmra.mxu0 %v2693_v51 }
  0xbe   : > { %1541 = vmatprep.mubr.bf16.mxu1 %v2694_v52  ;;  %2502 = vmatprep.mubr.bf16.mxu0 %v2696_v53 }
  0xc5   : > { %1542 = vmatmul.mubr.bf16.gmra.mxu1 %v2697_v54  ;;  %2503 = vmatmul.mubr.bf16.gmra.mxu0 %v2698_v55 }
  0xed   : > { %v2226_v56 = vpop.f32.mrf.mxu0  ;;  %v2298_v57 = vpop.f32.mrf.mxu1 }
  0xef   : > { %v2227_v58 = vpop.f32.mrf.mxu0  ;;  %v2299_v59 = vpop.f32.mrf.mxu1 }
  0xf0   : > { %v2974_v60 = vadd.f32 %v2227_v58, %v2226_v56  ;;  %v2976_v61 = vadd.f32 %v2299_v59, %v2298_v57 }
  0xf1   : > { %v2229_v62 = vpop.f32.mrf.mxu0  ;;  %v2301_v63 = vpop.f32.mrf.mxu1 }
  0xf2   : > { %3337 = vst [vmem:[#allocation3_spill] sm:$0xff] %v2976_v61 }
  0xf3   : > { %v2230_v0 = vpop.f32.mrf.mxu0  ;;  %v2302_v1 = vpop.f32.mrf.mxu1 }
  0xf4   : > { %v2978_v2 = vadd.f32 %v2230_v0, %v2229_v62  ;;  %v2980_v3 = vadd.f32 %v2302_v1, %v2301_v63 }
  0xf5   : > { %v2232_v4 = vpop.f32.mrf.mxu0  ;;  %v2304_v5 = vpop.f32.mrf.mxu1 }
  0xf6   : > { %3338 = vst [vmem:[#allocation4_spill] sm:$0xff] %v2980_v3 }
  0xf7   : > { %v2233_v6 = vpop.f32.mrf.mxu0  ;;  %v2305_v7 = vpop.f32.mrf.mxu1 }
  0xf8   : > { %v2982_v8 = vadd.f32 %v2233_v6, %v2232_v4  ;;  %v2984_v9 = vadd.f32 %v2305_v7, %v2304_v5 }
  0xf9   : > { %v2235_v10 = vpop.f32.mrf.mxu0  ;;  %v2307_v11 = vpop.f32.mrf.mxu1 }
  0xfa   : > { %3339 = vst [vmem:[#allocation5_spill] sm:$0xff] %v2984_v9 }
  0xfb   : > { %v2236_v12 = vpop.f32.mrf.mxu0  ;;  %v2308_v13 = vpop.f32.mrf.mxu1 }
  0xfc   : > { %v2986_v14 = vadd.f32 %v2236_v12, %v2235_v10  ;;  %v2988_v15 = vadd.f32 %v2308_v13, %v2307_v11 }
  0xfd   : > { %v2238_v16 = vpop.f32.mrf.mxu0  ;;  %v2310_v17 = vpop.f32.mrf.mxu1 }
  0xfe   : > { %3340 = vst [vmem:[#allocation6_spill] sm:$0xff] %v2988_v15 }
  0xff   : > { %v2239_v18 = vpop.f32.mrf.mxu0  ;;  %v2311_v19 = vpop.f32.mrf.mxu1 }
 0x100   : > { %v2990_v20 = vadd.f32 %v2239_v18, %v2238_v16  ;;  %v2992_v21 = vadd.f32 %v2311_v19, %v2310_v17 }
 0x101   : > { %v2241_v22 = vpop.f32.mrf.mxu0  ;;  %v2313_v23 = vpop.f32.mrf.mxu1 }
 0x102   : > { %3341 = vst [vmem:[#allocation7_spill] sm:$0xff] %v2992_v21 }
 0x103   : > { %v2242_v24 = vpop.f32.mrf.mxu0  ;;  %v2314_v25 = vpop.f32.mrf.mxu1 }
 0x104   : > { %v2994_v26 = vadd.f32 %v2242_v24, %v2241_v22  ;;  %v2996_v27 = vadd.f32 %v2314_v25, %v2313_v23 }
 0x105   : > { %v2244_v28 = vpop.f32.mrf.mxu0  ;;  %v2316_v29 = vpop.f32.mrf.mxu1 }
 0x106   : > { %3342 = vst [vmem:[#allocation8_spill] sm:$0xff] %v2996_v27 }
 0x107   : > { %v2245_v30 = vpop.f32.mrf.mxu0  ;;  %v2317_v31 = vpop.f32.mrf.mxu1 }
 0x108   : > { %v2998_v32 = vadd.f32 %v2245_v30, %v2244_v28  ;;  %v3000_v33 = vadd.f32 %v2317_v31, %v2316_v29 }
 0x109   : > { %v2247_v34 = vpop.f32.mrf.mxu0  ;;  %v2319_v35 = vpop.f32.mrf.mxu1 }
 0x10a   : > { %3343 = vst [vmem:[#allocation9_spill] sm:$0xff] %v3000_v33 }
 0x10b   : > { %v2248_v36 = vpop.f32.mrf.mxu0  ;;  %v2320_v37 = vpop.f32.mrf.mxu1 }
 0x10c   : > { %v3002_v38 = vadd.f32 %v2248_v36, %v2247_v34  ;;  %v3004_v39 = vadd.f32 %v2320_v37, %v2319_v35 }
 0x10d   : > { %v2250_v40 = vpop.f32.mrf.mxu0  ;;  %v3006_v41 = vpop.f32.mrf.mxu1 }
 0x10e   : > { %3344 = vst [vmem:[#allocation10_spill] sm:$0xff] %v3004_v39 }
 0x10f   : > { %v2251_v42 = vpop.f32.mrf.mxu0  ;;  %v3008_v43 = vpop.f32.mrf.mxu1 }
 0x110   : > { %v3010_v44 = vadd.f32 %v2251_v42, %v2250_v40 }
 0x111   : > { %v2253_v45 = vpop.f32.mrf.mxu0  ;;  %v3012_v46 = vpop.f32.mrf.mxu1 }
 0x113   : > { %v2254_v47 = vpop.f32.mrf.mxu0  ;;  %v3014_v48 = vpop.f32.mrf.mxu1 }
 0x114   : > { %v3016_v49 = vadd.f32 %v2254_v47, %v2253_v45 }
 0x115   : > { %v2256_v50 = vpop.f32.mrf.mxu0  ;;  %v2344_v51 = vpop.f32.mrf.mxu1 }
 0x117   : > { %v2257_v52 = vpop.f32.mrf.mxu0  ;;  %v2345_v53 = vpop.f32.mrf.mxu1 }
 0x118   : > { %v3018_v54 = vadd.f32 %v2257_v52, %v2256_v50  ;;  %v2346_v61 = vadd.f32 %v2345_v53, %v2344_v51  ;;  %v2343_v53 = vadd.f32 %v3014_v48, %v3012_v46 }
 0x119   : > { %v2259_v55 = vpop.f32.mrf.mxu0  ;;  %v2347_v56 = vpop.f32.mrf.mxu1 }
 0x11a   : > { %v1432_v51 = vadd.f32 %v2346_v61, %v2982_v8 }
 0x11b   : > { %v2260_v57 = vpop.f32.mrf.mxu0  ;;  %v2348_v58 = vpop.f32.mrf.mxu1 }
 0x11c   : > { %v3020_v59 = vadd.f32 %v2260_v57, %v2259_v55 }
 0x11d   : > { %v2262_v62 = vpop.f32.mrf.mxu0  ;;  %v3022_v63 = vpop.f32.mrf.mxu1 }
 0x11f   : > { %v2263_v0 = vpop.f32.mrf.mxu0  ;;  %v3024_v1 = vpop.f32.mrf.mxu1 }
 0x120   : > { %v3026_v4 = vadd.f32 %v2263_v0, %v2262_v62 }
 0x121   : > { %v2265_v5 = vpop.f32.mrf.mxu0  ;;  %v3028_v6 = vpop.f32.mrf.mxu1 }
 0x123   : > { %v2266_v7 = vpop.f32.mrf.mxu0  ;;  %v3030_v10 = vpop.f32.mrf.mxu1 }
 0x124   : > { %v3032_v11 = vadd.f32 %v2266_v7, %v2265_v5 }
 0x125   : > { %v3034_v12 = vpop.f32.mrf.mxu0  ;;  %v2356_v13 = vpop.f32.mrf.mxu1 }
 0x127   : > { %v3036_v16 = vpop.f32.mrf.mxu0  ;;  %v2357_v17 = vpop.f32.mrf.mxu1 }
 0x128   : > { %v2358_v61 = vadd.f32 %v2357_v17, %v2356_v13  ;;  %v2352_v13 = vadd.f32 %v3024_v1, %v3022_v63  ;;  %v1850_v1 = vld [vmem:[%s3114_s20 + $0x8] sm:$0xff] }
 0x129   : > { %v3038_v18 = vpop.f32.mrf.mxu0  ;;  %v3040_v19 = vpop.f32.mrf.mxu1 }
 0x12a   : > { %v1448_v63 = vadd.f32 %v2358_v61, %v2998_v32 }
 0x12b   : > { %v3042_v22 = vpop.f32.mrf.mxu0  ;;  %v2360_v23 = vpop.f32.mrf.mxu1 }
 0x12d   : > { %v3044_v24 = vpop.f32.mrf.mxu0  ;;  %v3046_v25 = vpop.f32.mrf.mxu1 }
 0x12f   : > { %v3048_v28 = vpop.f32.mrf.mxu0  ;;  %v3050_v29 = vpop.f32.mrf.mxu1 }
 0x131   : > { %v3052_v30 = vpop.f32.mrf.mxu0  ;;  %v3054_v31 = vpop.f32.mrf.mxu1 }
 0x132   : > { %3345 = vst [vmem:[#allocation11_spill] sm:$0xff] %v3052_v30 }
 0x133   : > { %v3056_v34 = vpop.f32.mrf.mxu0  ;;  %v3058_v35 = vpop.f32.mrf.mxu1 }
 0x134   : > { %3346 = vst [vmem:[#allocation12_spill] sm:$0xff] %v3056_v34 }
 0x135   : > { %v3060_v36 = vpop.f32.mrf.mxu0  ;;  %v3062_v37 = vpop.f32.mrf.mxu1 }
 0x137   : > { %v3064_v40 = vpop.f32.mrf.mxu0  ;;  %v3066_v42 = vpop.f32.mrf.mxu1 }
 0x139   : > { %v3068_v45 = vpop.f32.mrf.mxu0  ;;  %v3070_v47 = vpop.f32.mrf.mxu1 }
 0x13b   : > { %v3072_v50 = vpop.f32.mrf.mxu0  ;;  %v3074_v52 = vpop.f32.mrf.mxu1 }
 0x13c   : > { %3347 = vst [vmem:[#allocation13_spill] sm:$0xff] %v3072_v50 }
 0x13d   : > { %v3076_v55 = vpop.f32.mrf.mxu0  ;;  %v3078_v57 = vpop.f32.mrf.mxu1 }
 0x13e   : > { %3348 = vst [vmem:[#allocation14_spill] sm:$0xff] %v3076_v55 }
 0x13f   : > { %v3080_v62 = vpop.f32.mrf.mxu0  ;;  %v3082_v0 = vpop.f32.mrf.mxu1 }
 0x140   : > { %3349 = vst [vmem:[#allocation15_spill] sm:$0xff] %v3080_v62 }
 0x141   : > { %v3084_v5 = vpop.f32.mrf.mxu0  ;;  %v3086_v7 = vpop.f32.mrf.mxu1 }
 0x142   : > { %3350 = vst [vmem:[#allocation16_spill] sm:$0xff] %v3084_v5  ;;  %v2340_v5 = vadd.f32 %v3008_v43, %v3006_v41  ;;  %v3124_v43 = vld [vmem:[%s3334_s2] ss:$0 sm:$0xff] }
 0x143   : > { %v3088_v39 = vpop.f32.mrf.mxu0  ;;  %v3090_v27 = vpop.f32.mrf.mxu1 }
 0x144   : > { %3351 = vst [vmem:[#allocation17_spill] sm:$0xff] %v3088_v39 }
 0x145   : > { %v3092_v33 = vpop.f32.mrf.mxu0  ;;  %v3094_v21 = vpop.f32.mrf.mxu1 }
 0x146   : > { %3352 = vst [vmem:[#allocation18_spill] sm:$0xff] %v3092_v33  ;;  %v2349_v33 = vadd.f32 %v2348_v58, %v2347_v56  ;;  %v1424_v58 = vadd.f32 %v2340_v5, %v2974_v60  ;;  %v1427_v5 = vadd.f32 %v2343_v53, %v2978_v2 }
 0x147   : > { %v3096_v3 = vpop.f32.mrf.mxu0  ;;  %v3098_v15 = vpop.f32.mrf.mxu1 }
 0x148   : > { %3353 = vst [vmem:[#allocation19_spill] sm:$0xff] %v3096_v3  ;;  %v1435_v48 = vadd.f32 %v2349_v33, %v2986_v14 }
 0x149   : > { %v3100_v9 = vpop.f32.mrf.mxu0  ;;  %v3102_v62 = vpop.f32.mrf.mxu1 }
 0x14a   : > { %3354 = vst [vmem:[#allocation20_spill] sm:$0xff] %v3100_v9 }
 0x14b   : > { %v3107_v39 = vpop.f32.mrf.mxu0  ;;  %v3109_v55 = vpop.f32.mrf.mxu1 }
 0x14c   : > { %3355 = vst [vmem:[#allocation21_spill] sm:$0xff] %v3107_v39  ;;  %v1851_v39 = vld [vmem:[%s3114_s20 + $0x10] sm:$0xff] }
 0x14d   : > { %v3119_v9 = vpop.f32.mrf.mxu1  ;;  %v2476_v41 = vpop.f32.mrf.mxu0 }
 0x14e   : > { %v1593_v56 = vadd.f32 %v2476_v41, %v1432_v51  ;;  %v1849_v51 = vld [vmem:[%s3114_s20] sm:$0xff] }
 0x14f   : > { %v3128_v3 = vpop.f32.mrf.mxu1  ;;  %v1584_v34 = vpop.f32.mrf.mxu0 }
 0x150   : > { %v1819_v8 = vadd.f32 %v3124_v43, %v1593_v56  ;;  %v1585_v46 = vadd.f32 %v1584_v34, %v1424_v58  ;;  %v2361_v34 = vadd.f32 %v2360_v23, %v3040_v19  ;;  %v1852_v56 = vld [vmem:[%s3114_s20 + $0x18] sm:$0xff] }
 0x151   : > { %v3138_v41 = vpop.f32.mrf.mxu1  ;;  %v2477_v60 = vpop.f32.mrf.mxu0 }
 0x152   : > { %3356 = vst [vmem:[#allocation22_spill] sm:$0xff] %v3138_v41  ;;  %v1883_v17 = vadd.f32 %v1851_v39, %v1819_v8  ;;  %v1817_v14 = vadd.f32 %v3124_v43, %v1585_v46  ;;  %v1596_v33 = vadd.f32 %v2477_v60, %v1435_v48  ;;  %v2355_v39 = vadd.f32 %v3030_v10, %v3028_v6  ;;  %v1853_v60 = vld [vmem:[%s3114_s20 + $0x20] sm:$0xff] }
 0x153   : > { %v3146_v58 = vpop.f32.mrf.mxu1  ;;  %v1587_v30 = vpop.f32.mrf.mxu0  ;;  %v1440_v48 = vadd.f32 %v2352_v13, %v2990_v20  ;;  %v1451_v61 = vadd.f32 %v2361_v34, %v3002_v38  ;;  %v2370_v6 = vadd.f32 %v3066_v42, %v3062_v37  ;;  %v2364_v38 = vadd.f32 %v3050_v29, %v3046_v25 }
 0x154   : > { %1915 = vst [vmem:[%s3135_s25 + $0x10] sm:$0xff] %v1883_v17  ;;  %v1881_v41 = vadd.f32 %v1849_v51, %v1817_v14  ;;  %v1820_v50 = vadd.f32 %v3124_v43, %v1596_v33  ;;  %v1588_v2 = vadd.f32 %v1587_v30, %v1427_v5  ;;  %v1855_v30 = vld [vmem:[%s3114_s20 + $0x30] sm:$0xff]  ;;  %v1443_v13 = vadd.f32 %v2355_v39, %v2994_v26  ;;  %v1856_v33 = vld [vmem:[%s3114_s20 + $0x38] sm:$0xff]  ;;  %v1854_v39 = vld [vmem:[%s3114_s20 + $0x28] sm:$0xff] }
 0x155   : > { %v3154_v53 = vpop.f32.mrf.mxu1  ;;  %v2480_v19 = vpop.f32.mrf.mxu0  ;;  %v2373_v14 = vadd.f32 %v3074_v52, %v3070_v47  ;;  %v1464_v25 = vadd.f32 %v2370_v6, %v3018_v54  ;;  %v2367_v29 = vadd.f32 %v3058_v35, %v3054_v31  ;;  %v2382_v31 = vadd.f32 %v3098_v15, %v3094_v21  ;;  %v1857_v6 = vld [vmem:[%s3114_s20 + $0x40] sm:$0xff] }
 0x156   : > { %1913 = vst [vmem:[%s3135_s25] sm:$0xff] %v1881_v41  ;;  %v1884_v23 = vadd.f32 %v1852_v56, %v1820_v50  ;;  %v1818_v8 = vadd.f32 %v3124_v43, %v1588_v2  ;;  %v1609_v46 = vadd.f32 %v2480_v19, %v1448_v63 }
 0x157   : > { %v3160_v51 = vpop.f32.mrf.mxu1  ;;  %v1600_v32 = vpop.f32.mrf.mxu0 }
 0x158   : > { %1916 = vst [vmem:[%s3135_s25 + $0x18] sm:$0xff] %v1884_v23  ;;  %v1882_v10 = vadd.f32 %v1850_v1, %v1818_v8  ;;  %v1823_v50 = vadd.f32 %v3124_v43, %v1609_v46  ;;  %v1601_v41 = vadd.f32 %v1600_v32, %v1440_v48  ;;  %v1456_v8 = vadd.f32 %v2364_v38, %v3010_v44  ;;  %v1859_v46 = vld [vmem:[%s3114_s20 + $0x50] sm:$0xff] }
 0x159   : > { %v3168_v5 = vpop.f32.mrf.mxu1  ;;  %v2481_v20 = vpop.f32.mrf.mxu0  ;;  %v2270_v44 = vadd.f32 %v3036_v16, %v3034_v12  ;;  %v1860_v12 = vld [vmem:[%s3114_s20 + $0x58] sm:$0xff] }
 0x15a   : > { %1914 = vst [vmem:[%s3135_s25 + $0x8] sm:$0xff] %v1882_v10  ;;  %v1887_v17 = vadd.f32 %v1855_v30, %v1823_v50  ;;  %v1821_v37 = vadd.f32 %v3124_v43, %v1601_v41  ;;  %v1612_v42 = vadd.f32 %v2481_v20, %v1451_v61  ;;  %v1467_v30 = vadd.f32 %v2373_v14, %v3020_v59 }
 0x15b   : > { %v3178_v34 = vpop.f32.mrf.mxu1  ;;  %v1603_v56 = vpop.f32.mrf.mxu0  ;;  %v1459_v41 = vadd.f32 %v2367_v29, %v3016_v49  ;;  %v2376_v59 = vadd.f32 %v3082_v0, %v3078_v57  ;;  %v2385_v20 = vadd.f32 %v3109_v55, %v3102_v62  ;;  %v1480_v0 = vadd.f32 %v2382_v31, %v2270_v44 }
 0x15c   : > { %1919 = vst [vmem:[%s3135_s25 + $0x30] sm:$0xff] %v1887_v17  ;;  %v1885_v26 = vadd.f32 %v1853_v60, %v1821_v37  ;;  %v1824_v2 = vadd.f32 %v3124_v43, %v1612_v42  ;;  %v1604_v63 = vadd.f32 %v1603_v56, %v1443_v13  ;;  %v2273_v17 = vadd.f32 %v3042_v22, %v3038_v18  ;;  %v1858_v42 = vld [vmem:[%s3114_s20 + $0x48] sm:$0xff] }
 0x15d   : > { %v3186_v1 = vpop.f32.mrf.mxu1  ;;  %v2484_v47 = vpop.f32.mrf.mxu0  ;;  %v2379_v37 = vadd.f32 %v3090_v27, %v3086_v7  ;;  %v2394_v18 = vadd.f32 %v3160_v51, %v3154_v53 }
 0x15e   : > { %1917 = vst [vmem:[%s3135_s25 + $0x20] sm:$0xff] %v1885_v26  ;;  %v1888_v52 = vadd.f32 %v1856_v33, %v1824_v2  ;;  %v1822_v19 = vadd.f32 %v3124_v43, %v1604_v63  ;;  %v1625_v23 = vadd.f32 %v2484_v47, %v1464_v25  ;;  %v1472_v26 = vadd.f32 %v2376_v59, %v3026_v4  ;;  %v1863_v2 = vld [vmem:[%s3114_s20 + $0x70] sm:$0xff]  ;;  %v1861_v47 = vld [vmem:[%s3114_s20 + $0x60] sm:$0xff] }
 0x15f   : > { %v3192_v48 = vpop.f32.mrf.mxu1  ;;  %v1616_v54 = vpop.f32.mrf.mxu0  ;;  %v1483_v29 = vadd.f32 %v2385_v20, %v2273_v17  ;;  %v3359_v59 = vld [vmem:[#allocation11_spill] sm:$0xff] }
 0x160   : > { %1920 = vst [vmem:[%s3135_s25 + $0x38] sm:$0xff] %v1888_v52  ;;  %v1886_v35 = vadd.f32 %v1854_v39, %v1822_v19  ;;  %v1827_v32 = vadd.f32 %v3124_v43, %v1625_v23  ;;  %v1617_v61 = vadd.f32 %v1616_v54, %v1456_v8  ;;  %v2282_v39 = vadd.f32 %v3064_v40, %v3060_v36  ;;  %v1864_v40 = vld [vmem:[%s3114_s20 + $0x78] sm:$0xff] }
 0x161   : > { %v3202_v10 = vpop.f32.mrf.mxu1  ;;  %v2485_v50 = vpop.f32.mrf.mxu0  ;;  %v1475_v19 = vadd.f32 %v2379_v37, %v3032_v11  ;;  %v2388_v23 = vadd.f32 %v3128_v3, %v3119_v9  ;;  %v2397_v36 = vadd.f32 %v3178_v34, %v3168_v5  ;;  %v1865_v37 = vld [vmem:[%s3114_s20 + $0x80] sm:$0xff] }
 0x162   : > { %1918 = vst [vmem:[%s3135_s25 + $0x28] sm:$0xff] %v1886_v35  ;;  %v1891_v15 = vadd.f32 %v1859_v46, %v1827_v32  ;;  %v1825_v21 = vadd.f32 %v3124_v43, %v1617_v61  ;;  %v1628_v60 = vadd.f32 %v2485_v50, %v1467_v30  ;;  %v2276_v46 = vadd.f32 %v3048_v28, %v3044_v24  ;;  %v3357_v35 = vld [vmem:[#allocation13_spill] sm:$0xff]  ;;  %v3358_v61 = vld [vmem:[#allocation22_spill] sm:$0xff]  ;;  %v1862_v28 = vld [vmem:[%s3114_s20 + $0x68] sm:$0xff] }
 0x163   : > { %v3212_v16 = vpop.f32.mrf.mxu1  ;;  %v1619_v13 = vpop.f32.mrf.mxu0  ;;  %v1496_v31 = vadd.f32 %v2394_v18, %v2282_v39  ;;  %v2285_v32 = vadd.f32 %v3357_v35, %v3068_v45  ;;  %v2391_v24 = vadd.f32 %v3146_v58, %v3358_v61  ;;  %v1868_v18 = vld [vmem:[%s3114_s20 + $0x98] sm:$0xff] }
 0x164   : > { %1923 = vst [vmem:[%s3135_s25 + $0x50] sm:$0xff] %v1891_v15  ;;  %v1889_v49 = vadd.f32 %v1857_v6, %v1825_v21  ;;  %v1828_v38 = vadd.f32 %v3124_v43, %v1628_v60  ;;  %v1620_v57 = vadd.f32 %v1619_v13, %v1459_v41  ;;  %v1488_v41 = vadd.f32 %v2388_v23, %v2276_v46  ;;  %v3360_v15 = vld [vmem:[#allocation12_spill] sm:$0xff]  ;;  %v1867_v60 = vld [vmem:[%s3114_s20 + $0x90] sm:$0xff] }
 0x165   : > { %v2404_v55 = vpop.f32.mrf.mxu1  ;;  %v2488_v62 = vpop.f32.mrf.mxu0  ;;  %v2279_v21 = vadd.f32 %v3360_v15, %v3359_v59  ;;  %v2403_v23 = vadd.f32 %v3212_v16, %v3202_v10  ;;  %v1872_v15 = vld [vmem:[%s3114_s20 + $0xb8] sm:$0xff] }
 0x166   : > { %1921 = vst [vmem:[%s3135_s25 + $0x40] sm:$0xff] %v1889_v49  ;;  %v1892_v14 = vadd.f32 %v1860_v12, %v1828_v38  ;;  %v1826_v33 = vadd.f32 %v3124_v43, %v1620_v57  ;;  %v1641_v56 = vadd.f32 %v2488_v62, %v1480_v0  ;;  %v1499_v12 = vadd.f32 %v2397_v36, %v2285_v32  ;;  %v3361_v57 = vld [vmem:[#allocation18_spill] sm:$0xff]  ;;  %v3362_v0 = vld [vmem:[#allocation19_spill] sm:$0xff] }
 0x167   : > { %v2405_v63 = vpop.f32.mrf.mxu1  ;;  %v1632_v25 = vpop.f32.mrf.mxu0  ;;  %v2294_v17 = vadd.f32 %v3362_v0, %v3361_v57 }
 0x168   : > { %1924 = vst [vmem:[%s3135_s25 + $0x58] sm:$0xff] %v1892_v14  ;;  %v1890_v27 = vadd.f32 %v1858_v42, %v1826_v33  ;;  %v1831_v22 = vadd.f32 %v3124_v43, %v1641_v56  ;;  %v1633_v7 = vadd.f32 %v1632_v25, %v1472_v26  ;;  %v2406_v13 = vadd.f32 %v2405_v63, %v2404_v55  ;;  %v3364_v63 = vld [vmem:[#allocation15_spill] sm:$0xff] }
 0x169   : > { %v2407_v4 = vpop.f32.mrf.mxu1  ;;  %v2489_v52 = vpop.f32.mrf.mxu0  ;;  %v1491_v14 = vadd.f32 %v2391_v24, %v2279_v21  ;;  %v2400_v33 = vadd.f32 %v3192_v48, %v3186_v1  ;;  %v1869_v24 = vld [vmem:[%s3114_s20 + $0xa0] sm:$0xff] }
 0x16a   : > { %1922 = vst [vmem:[%s3135_s25 + $0x48] sm:$0xff] %v1890_v27  ;;  %v1895_v53 = vadd.f32 %v1863_v2, %v1831_v22  ;;  %v1829_v51 = vadd.f32 %v3124_v43, %v1633_v7  ;;  %v1644_v8 = vadd.f32 %v2489_v52, %v1483_v29  ;;  %v3363_v2 = vld [vmem:[#allocation14_spill] sm:$0xff]  ;;  %v1512_v48 = vadd.f32 %v2406_v13, %v2294_v17  ;;  %v3366_v52 = vld [vmem:[#allocation21_spill] sm:$0xff] }
 0x16b   : > { %v2408_v54 = vpop.f32.mrf.mxu1  ;;  %v1635_v30 = vpop.f32.mrf.mxu0  ;;  %v2288_v25 = vadd.f32 %v3364_v63, %v3363_v2 }
 0x16c   : > { %1927 = vst [vmem:[%s3135_s25 + $0x70] sm:$0xff] %v1895_v53  ;;  %v1893_v11 = vadd.f32 %v1861_v47, %v1829_v51  ;;  %v1832_v3 = vadd.f32 %v3124_v43, %v1644_v8  ;;  %v1636_v9 = vadd.f32 %v1635_v30, %v1475_v19  ;;  %v2409_v29 = vadd.f32 %v2408_v54, %v2407_v4  ;;  %v3365_v47 = vld [vmem:[#allocation20_spill] sm:$0xff]  ;;  %v3368_v30 = vld [vmem:[#allocation17_spill] sm:$0xff] }
 0x16d   : > { %v2410_v44 = vpop.f32.mrf.mxu1  ;;  %v2492_v5 = vpop.f32.mrf.mxu0  ;;  %v2297_v19 = vadd.f32 %v3366_v52, %v3365_v47  ;;  %v1866_v53 = vld [vmem:[%s3114_s20 + $0x88] sm:$0xff] }
 0x16e   : > { %1925 = vst [vmem:[%s3135_s25 + $0x60] sm:$0xff] %v1893_v11  ;;  %v1896_v34 = vadd.f32 %v1864_v40, %v1832_v3  ;;  %v1830_v6 = vadd.f32 %v3124_v43, %v1636_v9  ;;  %v1657_v50 = vadd.f32 %v2492_v5, %v1496_v31  ;;  %v1504_v40 = vadd.f32 %v2400_v33, %v2288_v25  ;;  %v3367_v54 = vld [vmem:[#allocation16_spill] sm:$0xff]  ;;  %v1871_v3 = vld [vmem:[%s3114_s20 + $0xb0] sm:$0xff]  ;;  %v3371_v25 = vld [vmem:[#allocation6_spill] sm:$0xff] }
 0x16f   : > { %v2411_v45 = vpop.f32.mrf.mxu1  ;;  %v1648_v20 = vpop.f32.mrf.mxu0  ;;  %v2291_v11 = vadd.f32 %v3368_v30, %v3367_v54  ;;  %v1515_v35 = vadd.f32 %v2409_v29, %v2297_v19  ;;  %v1876_v19 = vld [vmem:[%s3114_s20 + $0xd8] sm:$0xff] }
 0x170   : > { %1928 = vst [vmem:[%s3135_s25 + $0x78] sm:$0xff] %v1896_v34  ;;  %v1894_v58 = vadd.f32 %v1862_v28, %v1830_v6  ;;  %v1835_v49 = vadd.f32 %v3124_v43, %v1657_v50  ;;  %v1649_v38 = vadd.f32 %v1648_v20, %v1488_v41  ;;  %v2412_v6 = vadd.f32 %v2411_v45, %v2410_v44  ;;  %v3369_v20 = vld [vmem:[#allocation5_spill] sm:$0xff]  ;;  %v1870_v45 = vld [vmem:[%s3114_s20 + $0xa8] sm:$0xff] }
 0x171   : > { %v2413_v42 = vpop.f32.mrf.mxu1  ;;  %v2493_v62 = vpop.f32.mrf.mxu0  ;;  %v1507_v34 = vadd.f32 %v2403_v23, %v2291_v11 }
 0x172   : > { %1926 = vst [vmem:[%s3135_s25 + $0x68] sm:$0xff] %v1894_v58  ;;  %v1899_v55 = vadd.f32 %v1867_v60, %v1835_v49  ;;  %v1833_v56 = vadd.f32 %v3124_v43, %v1649_v38  ;;  %v1660_v26 = vadd.f32 %v2493_v62, %v1499_v12 }
 0x173   : > { %v2414_v27 = vpop.f32.mrf.mxu1  ;;  %v1651_v22 = vpop.f32.mrf.mxu0 }
 0x174   : > { %1931 = vst [vmem:[%s3135_s25 + $0x90] sm:$0xff] %v1899_v55  ;;  %v1897_v7 = vadd.f32 %v1865_v37, %v1833_v56  ;;  %v1836_v39 = vadd.f32 %v3124_v43, %v1660_v26  ;;  %v1652_v1 = vadd.f32 %v1651_v22, %v1491_v14  ;;  %v2415_v44 = vadd.f32 %v2414_v27, %v2413_v42  ;;  %v3370_v14 = vld [vmem:[#allocation3_spill] sm:$0xff]  ;;  %v1875_v55 = vld [vmem:[%s3114_s20 + $0xd0] sm:$0xff] }
 0x175   : > { %v2416_v51 = vpop.f32.mrf.mxu1  ;;  %v2496_v4 = vpop.f32.mrf.mxu0  ;;  %v1520_v33 = vadd.f32 %v2412_v6, %v3370_v14 }
 0x176   : > { %1929 = vst [vmem:[%s3135_s25 + $0x80] sm:$0xff] %v1897_v7  ;;  %v1900_v8 = vadd.f32 %v1868_v18, %v1836_v39  ;;  %v1834_v46 = vadd.f32 %v3124_v43, %v1652_v1  ;;  %v1673_v36 = vadd.f32 %v2496_v4, %v1512_v48  ;;  %v1873_v18 = vld [vmem:[%s3114_s20 + $0xc0] sm:$0xff]  ;;  %v3372_v7 = vld [vmem:[#allocation4_spill] sm:$0xff] }
 0x177   : > { %v2417_v9 = vpop.f32.mrf.mxu1  ;;  %v1664_v31 = vpop.f32.mrf.mxu0  ;;  %v1523_v39 = vadd.f32 %v2415_v44, %v3372_v7 }
 0x178   : > { %1932 = vst [vmem:[%s3135_s25 + $0x98] sm:$0xff] %v1900_v8  ;;  %v1898_v10 = vadd.f32 %v1866_v53, %v1834_v46  ;;  %v1839_v16 = vadd.f32 %v3124_v43, %v1673_v36  ;;  %v2418_v32 = vadd.f32 %v2417_v9, %v2416_v51  ;;  %v1665_v61 = vadd.f32 %v1664_v31, %v1504_v40  ;;  %v1874_v46 = vld [vmem:[%s3114_s20 + $0xc8] sm:$0xff] }
 0x179   : > { %v2419_v28 = vpop.f32.mrf.mxu1  ;;  %v2497_v5 = vpop.f32.mrf.mxu0 }
 0x17a   : > { %1930 = vst [vmem:[%s3135_s25 + $0x88] sm:$0xff] %v1898_v10  ;;  %v1903_v50 = vadd.f32 %v1871_v3, %v1839_v16  ;;  %v1837_v41 = vadd.f32 %v3124_v43, %v1665_v61  ;;  %v1676_v59 = vadd.f32 %v2497_v5, %v1515_v35  ;;  %v1528_v12 = vadd.f32 %v2418_v32, %v3369_v20  ;;  %v3373_v3 = vld [vmem:[#allocation7_spill] sm:$0xff]  ;;  %v3374_v5 = vld [vmem:[#allocation9_spill] sm:$0xff] }
 0x17b   : > { %v2420_v21 = vpop.f32.mrf.mxu1  ;;  %v1667_v60 = vpop.f32.mrf.mxu0  ;;  %v1877_v61 = vld [vmem:[%s3114_s20 + $0xe0] sm:$0xff] }
 0x17c   : > { %1935 = vst [vmem:[%s3135_s25 + $0xb0] sm:$0xff] %v1903_v50  ;;  %v1901_v13 = vadd.f32 %v1869_v24, %v1837_v41  ;;  %v1840_v58 = vadd.f32 %v3124_v43, %v1676_v59  ;;  %v2421_v49 = vadd.f32 %v2420_v21, %v2419_v28  ;;  %v1668_v38 = vadd.f32 %v1667_v60, %v1507_v34  ;;  %v3375_v50 = vld [vmem:[#allocation8_spill] sm:$0xff] }
 0x17d   : > { %v2422_v57 = vpop.f32.mrf.mxu1  ;;  %v2500_v0 = vpop.f32.mrf.mxu0 }
 0x17e   : > { %1933 = vst [vmem:[%s3135_s25 + $0xa0] sm:$0xff] %v1901_v13  ;;  %v1904_v17 = vadd.f32 %v1872_v15, %v1840_v58  ;;  %v1838_v37 = vadd.f32 %v3124_v43, %v1668_v38  ;;  %v1689_v62 = vadd.f32 %v2500_v0, %v1528_v12  ;;  %v1531_v29 = vadd.f32 %v2421_v49, %v3371_v25  ;;  %v1879_v13 = vld [vmem:[%s3114_s20 + $0xf0] sm:$0xff]  ;;  %v1878_v58 = vld [vmem:[%s3114_s20 + $0xe8] sm:$0xff]  ;;  %v3376_v38 = vld [vmem:[#allocation10_spill] sm:$0xff] }
 0x17f   : > { %v2423_v56 = vpop.f32.mrf.mxu1  ;;  %v1680_v26 = vpop.f32.mrf.mxu0 }
 0x180   : > { %1936 = vst [vmem:[%s3135_s25 + $0xb8] sm:$0xff] %v1904_v17  ;;  %v1902_v2 = vadd.f32 %v1870_v45, %v1838_v37  ;;  %v1843_v42 = vadd.f32 %v3124_v43, %v1689_v62  ;;  %v1681_v63 = vadd.f32 %v1680_v26, %v1520_v33  ;;  %v2424_v48 = vadd.f32 %v2423_v56, %v2422_v57  ;;  %v1880_v37 = vld [vmem:[%s3114_s20 + $0xf8] sm:$0xff] }
 0x181   : > { %v2425_v27 = vpop.f32.mrf.mxu1  ;;  %v2501_v22 = vpop.f32.mrf.mxu0 }
 0x182   : > { %1934 = vst [vmem:[%s3135_s25 + $0xa8] sm:$0xff] %v1902_v2  ;;  %v1907_v1 = vadd.f32 %v1875_v55, %v1843_v42  ;;  %v1841_v47 = vadd.f32 %v3124_v43, %v1681_v63  ;;  %v1692_v52 = vadd.f32 %v2501_v22, %v1531_v29  ;;  %v1536_v9 = vadd.f32 %v2424_v48, %v3373_v3 }
 0x183   : > { %v2426_v23 = vpop.f32.mrf.mxu1  ;;  %v1683_v53 = vpop.f32.mrf.mxu0 }
 0x184   : > { %1939 = vst [vmem:[%s3135_s25 + $0xd0] sm:$0xff] %v1907_v1  ;;  %v1905_v51 = vadd.f32 %v1873_v18, %v1841_v47  ;;  %v1844_v4 = vadd.f32 %v3124_v43, %v1692_v52  ;;  %v1684_v8 = vadd.f32 %v1683_v53, %v1523_v39  ;;  %v2427_v30 = vadd.f32 %v2426_v23, %v2425_v27 }
 0x185   : > { %v2428_v36 = vpop.f32.mrf.mxu1  ;;  %v2504_v40 = vpop.f32.mrf.mxu0 }
 0x186   : > { %1937 = vst [vmem:[%s3135_s25 + $0xc0] sm:$0xff] %v1905_v51  ;;  %v1908_v54 = vadd.f32 %v1876_v19, %v1844_v4  ;;  %v1842_v11 = vadd.f32 %v3124_v43, %v1684_v8  ;;  %v1539_v41 = vadd.f32 %v2427_v30, %v3375_v50 }
 0x187   : > { %v2429_v31 = vpop.f32.mrf.mxu1  ;;  %v1696_v35 = vpop.f32.mrf.mxu0 }
 0x188   : > { %1940 = vst [vmem:[%s3135_s25 + $0xd8] sm:$0xff] %v1908_v54  ;;  %v1906_v10 = vadd.f32 %v1874_v46, %v1842_v11  ;;  %v2430_v16 = vadd.f32 %v2429_v31, %v2428_v36  ;;  %v1697_v32 = vadd.f32 %v1696_v35, %v1536_v9 }
 0x189   : > { %v2431_v24 = vpop.f32.mrf.mxu1  ;;  %v2505_v28 = vpop.f32.mrf.mxu0 }
 0x18a   : > { %1938 = vst [vmem:[%s3135_s25 + $0xc8] sm:$0xff] %v1906_v10  ;;  %v1544_v34 = vadd.f32 %v2430_v16, %v3374_v5  ;;  %v1845_v6 = vadd.f32 %v3124_v43, %v1697_v32 }
 0x18b   : > { %v2432_v59 = vpop.f32.mrf.mxu1  ;;  %v1699_v15 = vpop.f32.mrf.mxu0 }
 0x18c   : > { %v1705_v21 = vadd.f32 %v2504_v40, %v1544_v34  ;;  %v1909_v60 = vadd.f32 %v1877_v61, %v1845_v6  ;;  %v2433_v20 = vadd.f32 %v2432_v59, %v2431_v24  ;;  %v1700_v12 = vadd.f32 %v1699_v15, %v1539_v41 }
 0x18e   : > { %v1847_v49 = vadd.f32 %v3124_v43, %v1705_v21  ;;  %1941 = vst [vmem:[%s3135_s25 + $0xe0] sm:$0xff] %v1909_v60  ;;  %v1547_v44 = vadd.f32 %v2433_v20, %v3376_v38  ;;  %v1846_v45 = vadd.f32 %v3124_v43, %v1700_v12 }
 0x190   : > { %v1911_v57 = vadd.f32 %v1879_v13, %v1847_v49  ;;  %v1708_v0 = vadd.f32 %v2505_v28, %v1547_v44  ;;  %v1910_v17 = vadd.f32 %v1878_v58, %v1846_v45 }
 0x192   : > { %1943 = vst [vmem:[%s3135_s25 + $0xf0] sm:$0xff] %v1911_v57  ;;  %v1848_v62 = vadd.f32 %v3124_v43, %v1708_v0  ;;  %1942 = vst [vmem:[%s3135_s25 + $0xe8] sm:$0xff] %v1910_v17 }
 0x194   : > { %v1912_v14 = vadd.f32 %v1880_v37, %v1848_v62 }
 0x196   : > { %1944 = vst [vmem:[%s3135_s25 + $0xf8] sm:$0xff] %v1912_v14 }
 0x197 PF: > { %s14_s17 = sadd.s32 1, %s2721_s17   ;;  %s3377_s15 = smov %s2717_s16 }
 0x198   : > { %p11_p5 = scmp.ge.s32.totalorder %s14_s17, 4   ;;  %s3378_s16 = smov %s3380_s18 }
 0x19a   :  { %13 = sbr.rel (!%p11_p5) target bundleno = 2 (0x2), region = 83 }

</bundles_post_ra>
